<compile_context>
chip_gen: v6e
topology: v6e:2x2x1
jax: 0.10.0
libtpu: 0.0.40
codegen_flags: <defaults>
</compile_context>

<pallas_src>
import functools

import numpy as np
import jax
import jax.numpy as jnp
from jax.experimental import pallas as pl
from jax.experimental.pallas import tpu as pltpu


# ---------------------------------------------------------------------------
# Fused kernel: conv1 -> conv2 -> fc1 -> fc2 (+ activations), all in VMEM.
# ---------------------------------------------------------------------------
def _policy_kernel(a1_ref, g1_ref, g2_ref, b2_ref, wf1_ref, bf1_ref, wf2_ref,
                   bf2_ref, o_ref, y1_ref, *, batch):
    B = batch

    # ---- conv1: single MXU matmul (bf16 x bf16 -> f32) + ReLU (no bias) ----
    # a1 rows are (phase, t, b) with oh1 = 4*t + phase; columns (ci, ki, w).
    # y1 columns are co1*38 + ow1.
    y1 = jnp.dot(a1_ref[...], g1_ref[...], preferred_element_type=jnp.float32)
    y1_ref[...] = jnp.maximum(y1, 0.0).astype(jnp.bfloat16)

    # ---- conv2: accumulate 6 matmuls over kernel-H rows ki2 ----
    # ki2 = 4*d + ph  ->  rows oh1 = 4*oh2 + ki2 live at (ph, t = oh2 + d, b),
    # i.e. one contiguous 9*B-row slice per ki2 thanks to the phase ordering.
    y2 = jnp.zeros((9 * B, 144), jnp.float32)          # rows = oh2*B + b
    for ki2 in range(6):
        ph, d = ki2 % 4, ki2 // 4
        rows = y1_ref[pl.ds((ph * 10 + d) * B, 9 * B), :]          # (9B, 152)
        y2 = y2 + jnp.dot(rows, g2_ref[ki2],
                          preferred_element_type=jnp.float32)
    y2 = jnp.maximum(y2 + b2_ref[...], 0.0).astype(jnp.bfloat16)   # (9B, 144)

    # ---- fc1: 9 accumulated matmuls (one per conv2 output row oh2) ----
    # The B rows for each oh2 are contiguous; weight blocks are unpadded.
    h = jnp.zeros((B, 256), jnp.float32)
    for r in range(9):
        h = h + jnp.dot(y2[r * B:(r + 1) * B, :], wf1_ref[r],
                        preferred_element_type=jnp.float32)
    h = jnp.maximum(h + bf1_ref[...], 0.0)                          # (B, 256)

    # ---- fc2 + Sigmoid: VPU multiply + lane reduction (no 1-lane MXU) ----
    logit = jnp.sum(h * wf2_ref[...], axis=-1, keepdims=True) + bf2_ref[...]
    o_ref[...] = jax.nn.sigmoid(logit)


# ---------------------------------------------------------------------------
# One-time host-side restructuring of the PyTorch parameters (cached outside
# the per-forward jit, per the perf review).
# ---------------------------------------------------------------------------
def prepare_params(w1, w2, b2, wf1, bf1, wf2, bf2):
    f32 = jnp.float32

    # conv1 banded weight: g1[(ci*6+ki)*80 + w, co*38 + ow] = w1[co,ci,ki,w-2*ow]
    sel1 = np.zeros((6, 80, 38), np.float32)
    kj = np.arange(6)[:, None]
    ow = np.arange(38)[None, :]
    sel1[kj, 2 * ow + kj, ow] = 1.0
    g1 = jnp.einsum('abcd,dwz->bcwaz', w1.astype(f32), jnp.asarray(sel1))
    g1 = g1.reshape(2 * 6 * 80, 4 * 38).astype(jnp.bfloat16)        # (960, 152)

    # conv2 banded weight blocks (one per kernel-H row ki2, unpadded):
    #   g2[ki2, ci2*38 + v, co2*9 + ow2] = w2[co2, ci2, ki2, v - 4*ow2]
    sel2 = np.zeros((6, 38, 9), np.float32)
    kj2 = np.arange(6)[:, None]
    ow2 = np.arange(9)[None, :]
    sel2[kj2, 4 * ow2 + kj2, ow2] = 1.0
    g2 = jnp.einsum('abcd,dvz->cbvaz', w2.astype(f32), jnp.asarray(sel2))
    g2 = g2.reshape(6, 4 * 38, 16 * 9).astype(jnp.bfloat16)         # (6, 152, 144)

    b2row = jnp.repeat(b2.astype(f32), 9).reshape(1, 144)           # bias[co2*9+ow2]

    # fc1 weight blocks per conv2 output row oh2 (unpadded):
    #   wf1b[oh2, co2*9 + ow2, n] = wf1[n, co2*81 + oh2*9 + ow2]
    wf1b = wf1.astype(f32).reshape(256, 16, 9, 9).transpose(2, 1, 3, 0)
    wf1b = wf1b.reshape(9, 144, 256).astype(jnp.bfloat16)           # (9, 144, 256)

    bf1r = bf1.astype(f32).reshape(1, 256)
    wf2r = wf2.astype(f32).reshape(1, 256)
    bf2r = bf2.astype(f32).reshape(1, 1)
    return g1, g2, b2row, wf1b, bf1r, wf2r, bf2r


# ---------------------------------------------------------------------------
# Per-forward wrapper: host-side conv1 im2col + single pallas_call.
# ---------------------------------------------------------------------------
@jax.jit
def policy_forward(x, g1, g2, b2row, wf1b, bf1r, wf2r, bf2r):
    f32 = jnp.float32
    B = x.shape[0]

    # Host-side conv1 im2col (one contiguous bf16 DMA into the kernel):
    #   a1[(ph*10 + t)*B + b, (ci*6+ki)*80 + w] = x[b, ci, 8*t + 2*ph + ki, w]
    # (conv1 output row oh1 = 4*t + ph; rows with 8t+2ph+ki >= 80 are padding
    #  rows that the conv2 slices never read.)
    xp = jnp.pad(x.astype(f32), ((0, 0), (0, 0), (0, 4), (0, 0)))   # (B,2,84,80)
    hidx = (8 * np.arange(10)[None, :, None]
            + 2 * np.arange(4)[:, None, None]
            + np.arange(6)[None, None, :])                          # (4,10,6)
    rows = jnp.take(xp, jnp.asarray(hidx.reshape(-1)), axis=2)      # (B,2,240,80)
    rows = rows.reshape(B, 2, 4, 10, 6, 80)
    a1 = rows.transpose(2, 3, 0, 1, 4, 5).reshape(40 * B, 2 * 6 * 80)
    a1 = a1.astype(jnp.bfloat16)                                    # (40B, 960)

    flops = 2 * B * (40 * 960 * 152 + 6 * 9 * 152 * 144 + 9 * 144 * 256 + 256)
    bytes_accessed = ((a1.size + g1.size + g2.size + wf1b.size) * 2
                      + (b2row.size + bf1r.size + wf2r.size + bf2r.size + B) * 4)

    vmem = pl.BlockSpec(memory_space=pltpu.MemorySpace.VMEM)
    kernel = functools.partial(_policy_kernel, batch=B)
    return pl.pallas_call(
        kernel,
        out_shape=jax.ShapeDtypeStruct((B, 1), f32),
        in_specs=[vmem] * 8,
        out_specs=vmem,
        scratch_shapes=[pltpu.VMEM((40 * B, 152), jnp.bfloat16)],   # conv1 output
        compiler_params=pltpu.CompilerParams(vmem_limit_bytes=16 * 1024 * 1024),
        cost_estimate=pl.CostEstimate(flops=flops, transcendentals=B,
                                      bytes_accessed=bytes_accessed),
    )(a1, g1, g2, b2row, wf1b, bf1r, wf2r, bf2r)


# ---------------------------------------------------------------------------
# Pure-JAX reference (mirrors PyTorch semantics exactly) for validation.
# ---------------------------------------------------------------------------
def _reference_forward(x, w1, w2, b2, wf1, bf1, wf2, bf2):
    B = x.shape[0]

    def im2col(a, k, s):
        _, C, H, W = a.shape
        OH = (H - k) // s + 1
        OW = (W - k) // s + 1
        cols = [a[:, c, i:i + s * OH:s, j:j + s * OW:s]
                for c in range(C) for i in range(k) for j in range(k)]
        p = jnp.stack(cols, axis=-1)                 # (B, OH, OW, C*k*k)
        return p.reshape(B * OH * OW, C * k * k), OH, OW

    p1, oh1, ow1 = im2col(x, 6, 2)
    y1 = jnp.maximum(p1 @ w1.reshape(4, -1).T, 0.0)
    y1 = y1.reshape(B, oh1, ow1, 4).transpose(0, 3, 1, 2)
    p2, oh2, ow2 = im2col(y1, 6, 4)
    y2 = jnp.maximum(p2 @ w2.reshape(16, -1).T + b2[None, :], 0.0)
    feat = y2.reshape(B, oh2, ow2, 16).transpose(0, 3, 1, 2).reshape(B, -1)
    h = jnp.maximum(feat @ wf1.T + bf1[None, :], 0.0)
    return jax.nn.sigmoid(h @ wf2.T + bf2[None, :])


if __name__ == "__main__":
    key = jax.random.PRNGKey(0)
    ks = jax.random.split(key, 8)

    B = 2
    # Input must be (B, 2, 80, 80) since the module hardcodes self.size = 9*9*16.
    x = jax.random.normal(ks[0], (B, 2, 80, 80), jnp.float32)

    # Deterministic synthetic parameters (PyTorch shapes).
    w1 = jax.random.normal(ks[1], (4, 2, 6, 6), jnp.float32) * 0.10    # conv1 (no bias)
    w2 = jax.random.normal(ks[2], (16, 4, 6, 6), jnp.float32) * 0.10   # conv2 weight
    b2 = jax.random.normal(ks[3], (16,), jnp.float32) * 0.10           # conv2 bias
    wf1 = jax.random.normal(ks[4], (256, 1296), jnp.float32) * 0.02    # fc1 weight
    bf1 = jax.random.normal(ks[5], (256,), jnp.float32) * 0.02         # fc1 bias
    wf2 = jax.random.normal(ks[6], (1, 256), jnp.float32) * 0.05       # fc2 weight
    bf2 = jax.random.normal(ks[7], (1,), jnp.float32) * 0.05           # fc2 bias

    # Weight restructuring happens once (cached across forward calls).
    params = prepare_params(w1, w2, b2, wf1, bf1, wf2, bf2)

    out = policy_forward(x, *params)
    out = jax.block_until_ready(out)

    ref = _reference_forward(x, w1, w2, b2, wf1, bf1, wf2, bf2)

    assert out.shape == (B, 1), out.shape
    assert bool(jnp.all((out >= 0.0) & (out <= 1.0)))            # sigmoid range
    max_err = float(jnp.max(jnp.abs(out - ref)))
    assert max_err < 5e-2, max_err
    print("KERNEL_OK")
</pallas_src>

<mosaic_0001>
module attributes {stable_mosaic.version = 11 : i64} {
  func.func @_policy_kernel(%arg0: memref<80x960xbf16, #tpu.memory_space<vmem>>, %arg1: memref<960x152xbf16, #tpu.memory_space<vmem>>, %arg2: memref<6x152x144xbf16, #tpu.memory_space<vmem>>, %arg3: memref<1x144xf32, #tpu.memory_space<vmem>>, %arg4: memref<9x144x256xbf16, #tpu.memory_space<vmem>>, %arg5: memref<1x256xf32, #tpu.memory_space<vmem>>, %arg6: memref<1x256xf32, #tpu.memory_space<vmem>>, %arg7: memref<1x1xf32, #tpu.memory_space<vmem>>, %arg8: memref<2x1xf32, #tpu.memory_space<vmem>>, %arg9: memref<80x152xbf16, #tpu.memory_space<vmem>>) attributes {dimension_semantics = [], scalar_prefetch = 0 : i64, scratch_operands = 1 : i64, tpu.core_type = #tpu.core_type<tc>} {
    %c0 = arith.constant 0 : index
    %c0_0 = arith.constant 0 : index
    %0 = vector.load %arg0[%c0, %c0_0] : memref<80x960xbf16, #tpu.memory_space<vmem>>, vector<80x960xbf16>
    %c0_1 = arith.constant 0 : index
    %c0_2 = arith.constant 0 : index
    %1 = vector.load %arg1[%c0_1, %c0_2] : memref<960x152xbf16, #tpu.memory_space<vmem>>, vector<960x152xbf16>
    %cst = arith.constant dense<0.000000e+00> : vector<80x152xf32>
    %2 = tpu.matmul %0, %1, %cst {dimension_numbers = #tpu.dot_dimension_numbers<[1], [0], [0], [1], [0, 0, 1, 1], [], []>} : vector<80x960xbf16>, vector<960x152xbf16>, vector<80x152xf32> -> vector<80x152xf32>
    %cst_3 = arith.constant 0.000000e+00 : f32
    %3 = vector.broadcast %cst_3 : f32 to vector<80x152xf32>
    %4 = arith.maximumf %2, %3 : vector<80x152xf32>
    %5 = arith.truncf %4 : vector<80x152xf32> to vector<80x152xbf16>
    %c0_4 = arith.constant 0 : index
    %c0_5 = arith.constant 0 : index
    %6 = vector.load %arg9[%c0_4, %c0_5] : memref<80x152xbf16, #tpu.memory_space<vmem>>, vector<80x152xbf16>
    tpu.vector_store %arg9[%c0_4, %c0_5], %5 {strides = array<i32>} : memref<80x152xbf16, #tpu.memory_space<vmem>>, vector<80x152xbf16>,
    %cst_6 = arith.constant 0.000000e+00 : f32
    %7 = vector.broadcast %cst_6 : f32 to vector<18x144xf32>
    %c0_7 = arith.constant 0 : index
    %c0_8 = arith.constant 0 : index
    %8 = vector.load %arg9[%c0_7, %c0_8] : memref<80x152xbf16, #tpu.memory_space<vmem>>, vector<18x152xbf16>
    %c0_9 = arith.constant 0 : index
    %c0_10 = arith.constant 0 : index
    %c0_11 = arith.constant 0 : index
    %9 = vector.load %arg2[%c0_9, %c0_10, %c0_11] : memref<6x152x144xbf16, #tpu.memory_space<vmem>>, vector<1x152x144xbf16>
    %10 = vector.shape_cast %9 : vector<1x152x144xbf16> to vector<152x144xbf16>
    %cst_12 = arith.constant dense<0.000000e+00> : vector<18x144xf32>
    %11 = tpu.matmul %8, %10, %cst_12 {dimension_numbers = #tpu.dot_dimension_numbers<[1], [0], [0], [1], [0, 0, 1, 1], [], []>} : vector<18x152xbf16>, vector<152x144xbf16>, vector<18x144xf32> -> vector<18x144xf32>
    %12 = arith.addf %7, %11 : vector<18x144xf32>
    %c20 = arith.constant 20 : index
    %c0_13 = arith.constant 0 : index
    %13 = vector.load %arg9[%c20, %c0_13] : memref<80x152xbf16, #tpu.memory_space<vmem>>, vector<18x152xbf16>
    %c1 = arith.constant 1 : index
    %c0_14 = arith.constant 0 : index
    %c0_15 = arith.constant 0 : index
    %14 = vector.load %arg2[%c1, %c0_14, %c0_15] : memref<6x152x144xbf16, #tpu.memory_space<vmem>>, vector<1x152x144xbf16>
    %15 = vector.shape_cast %14 : vector<1x152x144xbf16> to vector<152x144xbf16>
    %cst_16 = arith.constant dense<0.000000e+00> : vector<18x144xf32>
    %16 = tpu.matmul %13, %15, %cst_16 {dimension_numbers = #tpu.dot_dimension_numbers<[1], [0], [0], [1], [0, 0, 1, 1], [], []>} : vector<18x152xbf16>, vector<152x144xbf16>, vector<18x144xf32> -> vector<18x144xf32>
    %17 = arith.addf %12, %16 : vector<18x144xf32>
    %c40 = arith.constant 40 : index
    %c0_17 = arith.constant 0 : index
    %18 = vector.load %arg9[%c40, %c0_17] : memref<80x152xbf16, #tpu.memory_space<vmem>>, vector<18x152xbf16>
    %c2 = arith.constant 2 : index
    %c0_18 = arith.constant 0 : index
    %c0_19 = arith.constant 0 : index
    %19 = vector.load %arg2[%c2, %c0_18, %c0_19] : memref<6x152x144xbf16, #tpu.memory_space<vmem>>, vector<1x152x144xbf16>
    %20 = vector.shape_cast %19 : vector<1x152x144xbf16> to vector<152x144xbf16>
    %cst_20 = arith.constant dense<0.000000e+00> : vector<18x144xf32>
    %21 = tpu.matmul %18, %20, %cst_20 {dimension_numbers = #tpu.dot_dimension_numbers<[1], [0], [0], [1], [0, 0, 1, 1], [], []>} : vector<18x152xbf16>, vector<152x144xbf16>, vector<18x144xf32> -> vector<18x144xf32>
    %22 = arith.addf %17, %21 : vector<18x144xf32>
    %c60 = arith.constant 60 : index
    %c0_21 = arith.constant 0 : index
    %23 = vector.load %arg9[%c60, %c0_21] : memref<80x152xbf16, #tpu.memory_space<vmem>>, vector<18x152xbf16>
    %c3 = arith.constant 3 : index
    %c0_22 = arith.constant 0 : index
    %c0_23 = arith.constant 0 : index
    %24 = vector.load %arg2[%c3, %c0_22, %c0_23] : memref<6x152x144xbf16, #tpu.memory_space<vmem>>, vector<1x152x144xbf16>
    %25 = vector.shape_cast %24 : vector<1x152x144xbf16> to vector<152x144xbf16>
    %cst_24 = arith.constant dense<0.000000e+00> : vector<18x144xf32>
    %26 = tpu.matmul %23, %25, %cst_24 {dimension_numbers = #tpu.dot_dimension_numbers<[1], [0], [0], [1], [0, 0, 1, 1], [], []>} : vector<18x152xbf16>, vector<152x144xbf16>, vector<18x144xf32> -> vector<18x144xf32>
    %27 = arith.addf %22, %26 : vector<18x144xf32>
    %c2_25 = arith.constant 2 : index
    %c0_26 = arith.constant 0 : index
    %28 = vector.load %arg9[%c2_25, %c0_26] : memref<80x152xbf16, #tpu.memory_space<vmem>>, vector<18x152xbf16>
    %c4 = arith.constant 4 : index
    %c0_27 = arith.constant 0 : index
    %c0_28 = arith.constant 0 : index
    %29 = vector.load %arg2[%c4, %c0_27, %c0_28] : memref<6x152x144xbf16, #tpu.memory_space<vmem>>, vector<1x152x144xbf16>
    %30 = vector.shape_cast %29 : vector<1x152x144xbf16> to vector<152x144xbf16>
    %cst_29 = arith.constant dense<0.000000e+00> : vector<18x144xf32>
    %31 = tpu.matmul %28, %30, %cst_29 {dimension_numbers = #tpu.dot_dimension_numbers<[1], [0], [0], [1], [0, 0, 1, 1], [], []>} : vector<18x152xbf16>, vector<152x144xbf16>, vector<18x144xf32> -> vector<18x144xf32>
    %32 = arith.addf %27, %31 : vector<18x144xf32>
    %c22 = arith.constant 22 : index
    %c0_30 = arith.constant 0 : index
    %33 = vector.load %arg9[%c22, %c0_30] : memref<80x152xbf16, #tpu.memory_space<vmem>>, vector<18x152xbf16>
    %c5 = arith.constant 5 : index
    %c0_31 = arith.constant 0 : index
    %c0_32 = arith.constant 0 : index
    %34 = vector.load %arg2[%c5, %c0_31, %c0_32] : memref<6x152x144xbf16, #tpu.memory_space<vmem>>, vector<1x152x144xbf16>
    %35 = vector.shape_cast %34 : vector<1x152x144xbf16> to vector<152x144xbf16>
    %cst_33 = arith.constant dense<0.000000e+00> : vector<18x144xf32>
    %36 = tpu.matmul %33, %35, %cst_33 {dimension_numbers = #tpu.dot_dimension_numbers<[1], [0], [0], [1], [0, 0, 1, 1], [], []>} : vector<18x152xbf16>, vector<152x144xbf16>, vector<18x144xf32> -> vector<18x144xf32>
    %37 = arith.addf %32, %36 : vector<18x144xf32>
    %c0_34 = arith.constant 0 : index
    %c0_35 = arith.constant 0 : index
    %38 = vector.load %arg3[%c0_34, %c0_35] : memref<1x144xf32, #tpu.memory_space<vmem>>, vector<1x144xf32>
    %39 = vector.broadcast %38 : vector<1x144xf32> to vector<18x144xf32>
    %40 = arith.addf %37, %39 : vector<18x144xf32>
    %cst_36 = arith.constant 0.000000e+00 : f32
    %41 = vector.broadcast %cst_36 : f32 to vector<18x144xf32>
    %42 = arith.maximumf %40, %41 : vector<18x144xf32>
    %43 = arith.truncf %42 : vector<18x144xf32> to vector<18x144xbf16>
    %cst_37 = arith.constant 0.000000e+00 : f32
    %44 = vector.broadcast %cst_37 : f32 to vector<2x256xf32>
    %45 = vector.extract_strided_slice %43 {offsets = [0, 0], sizes = [2, 144], strides = [1, 1]} : vector<18x144xbf16> to vector<2x144xbf16>
    %c0_38 = arith.constant 0 : index
    %c0_39 = arith.constant 0 : index
    %c0_40 = arith.constant 0 : index
    %46 = vector.load %arg4[%c0_38, %c0_39, %c0_40] : memref<9x144x256xbf16, #tpu.memory_space<vmem>>, vector<1x144x256xbf16>
    %47 = vector.shape_cast %46 : vector<1x144x256xbf16> to vector<144x256xbf16>
    %cst_41 = arith.constant dense<0.000000e+00> : vector<2x256xf32>
    %48 = tpu.matmul %45, %47, %cst_41 {dimension_numbers = #tpu.dot_dimension_numbers<[1], [0], [0], [1], [0, 0, 1, 1], [], []>} : vector<2x144xbf16>, vector<144x256xbf16>, vector<2x256xf32> -> vector<2x256xf32>
    %49 = arith.addf %44, %48 : vector<2x256xf32>
    %50 = vector.extract_strided_slice %43 {offsets = [2, 0], sizes = [2, 144], strides = [1, 1]} : vector<18x144xbf16> to vector<2x144xbf16>
    %c1_42 = arith.constant 1 : index
    %c0_43 = arith.constant 0 : index
    %c0_44 = arith.constant 0 : index
    %51 = vector.load %arg4[%c1_42, %c0_43, %c0_44] : memref<9x144x256xbf16, #tpu.memory_space<vmem>>, vector<1x144x256xbf16>
    %52 = vector.shape_cast %51 : vector<1x144x256xbf16> to vector<144x256xbf16>
    %cst_45 = arith.constant dense<0.000000e+00> : vector<2x256xf32>
    %53 = tpu.matmul %50, %52, %cst_45 {dimension_numbers = #tpu.dot_dimension_numbers<[1], [0], [0], [1], [0, 0, 1, 1], [], []>} : vector<2x144xbf16>, vector<144x256xbf16>, vector<2x256xf32> -> vector<2x256xf32>
    %54 = arith.addf %49, %53 : vector<2x256xf32>
    %55 = vector.extract_strided_slice %43 {offsets = [4, 0], sizes = [2, 144], strides = [1, 1]} : vector<18x144xbf16> to vector<2x144xbf16>
    %c2_46 = arith.constant 2 : index
    %c0_47 = arith.constant 0 : index
    %c0_48 = arith.constant 0 : index
    %56 = vector.load %arg4[%c2_46, %c0_47, %c0_48] : memref<9x144x256xbf16, #tpu.memory_space<vmem>>, vector<1x144x256xbf16>
    %57 = vector.shape_cast %56 : vector<1x144x256xbf16> to vector<144x256xbf16>
    %cst_49 = arith.constant dense<0.000000e+00> : vector<2x256xf32>
    %58 = tpu.matmul %55, %57, %cst_49 {dimension_numbers = #tpu.dot_dimension_numbers<[1], [0], [0], [1], [0, 0, 1, 1], [], []>} : vector<2x144xbf16>, vector<144x256xbf16>, vector<2x256xf32> -> vector<2x256xf32>
    %59 = arith.addf %54, %58 : vector<2x256xf32>
    %60 = vector.extract_strided_slice %43 {offsets = [6, 0], sizes = [2, 144], strides = [1, 1]} : vector<18x144xbf16> to vector<2x144xbf16>
    %c3_50 = arith.constant 3 : index
    %c0_51 = arith.constant 0 : index
    %c0_52 = arith.constant 0 : index
    %61 = vector.load %arg4[%c3_50, %c0_51, %c0_52] : memref<9x144x256xbf16, #tpu.memory_space<vmem>>, vector<1x144x256xbf16>
    %62 = vector.shape_cast %61 : vector<1x144x256xbf16> to vector<144x256xbf16>
    %cst_53 = arith.constant dense<0.000000e+00> : vector<2x256xf32>
    %63 = tpu.matmul %60, %62, %cst_53 {dimension_numbers = #tpu.dot_dimension_numbers<[1], [0], [0], [1], [0, 0, 1, 1], [], []>} : vector<2x144xbf16>, vector<144x256xbf16>, vector<2x256xf32> -> vector<2x256xf32>
    %64 = arith.addf %59, %63 : vector<2x256xf32>
    %65 = vector.extract_strided_slice %43 {offsets = [8, 0], sizes = [2, 144], strides = [1, 1]} : vector<18x144xbf16> to vector<2x144xbf16>
    %c4_54 = arith.constant 4 : index
    %c0_55 = arith.constant 0 : index
    %c0_56 = arith.constant 0 : index
    %66 = vector.load %arg4[%c4_54, %c0_55, %c0_56] : memref<9x144x256xbf16, #tpu.memory_space<vmem>>, vector<1x144x256xbf16>
    %67 = vector.shape_cast %66 : vector<1x144x256xbf16> to vector<144x256xbf16>
    %cst_57 = arith.constant dense<0.000000e+00> : vector<2x256xf32>
    %68 = tpu.matmul %65, %67, %cst_57 {dimension_numbers = #tpu.dot_dimension_numbers<[1], [0], [0], [1], [0, 0, 1, 1], [], []>} : vector<2x144xbf16>, vector<144x256xbf16>, vector<2x256xf32> -> vector<2x256xf32>
    %69 = arith.addf %64, %68 : vector<2x256xf32>
    %70 = vector.extract_strided_slice %43 {offsets = [10, 0], sizes = [2, 144], strides = [1, 1]} : vector<18x144xbf16> to vector<2x144xbf16>
    %c5_58 = arith.constant 5 : index
    %c0_59 = arith.constant 0 : index
    %c0_60 = arith.constant 0 : index
    %71 = vector.load %arg4[%c5_58, %c0_59, %c0_60] : memref<9x144x256xbf16, #tpu.memory_space<vmem>>, vector<1x144x256xbf16>
    %72 = vector.shape_cast %71 : vector<1x144x256xbf16> to vector<144x256xbf16>
    %cst_61 = arith.constant dense<0.000000e+00> : vector<2x256xf32>
    %73 = tpu.matmul %70, %72, %cst_61 {dimension_numbers = #tpu.dot_dimension_numbers<[1], [0], [0], [1], [0, 0, 1, 1], [], []>} : vector<2x144xbf16>, vector<144x256xbf16>, vector<2x256xf32> -> vector<2x256xf32>
    %74 = arith.addf %69, %73 : vector<2x256xf32>
    %75 = vector.extract_strided_slice %43 {offsets = [12, 0], sizes = [2, 144], strides = [1, 1]} : vector<18x144xbf16> to vector<2x144xbf16>
    %c6 = arith.constant 6 : index
    %c0_62 = arith.constant 0 : index
    %c0_63 = arith.constant 0 : index
    %76 = vector.load %arg4[%c6, %c0_62, %c0_63] : memref<9x144x256xbf16, #tpu.memory_space<vmem>>, vector<1x144x256xbf16>
    %77 = vector.shape_cast %76 : vector<1x144x256xbf16> to vector<144x256xbf16>
    %cst_64 = arith.constant dense<0.000000e+00> : vector<2x256xf32>
    %78 = tpu.matmul %75, %77, %cst_64 {dimension_numbers = #tpu.dot_dimension_numbers<[1], [0], [0], [1], [0, 0, 1, 1], [], []>} : vector<2x144xbf16>, vector<144x256xbf16>, vector<2x256xf32> -> vector<2x256xf32>
    %79 = arith.addf %74, %78 : vector<2x256xf32>
    %80 = vector.extract_strided_slice %43 {offsets = [14, 0], sizes = [2, 144], strides = [1, 1]} : vector<18x144xbf16> to vector<2x144xbf16>
    %c7 = arith.constant 7 : index
    %c0_65 = arith.constant 0 : index
    %c0_66 = arith.constant 0 : index
    %81 = vector.load %arg4[%c7, %c0_65, %c0_66] : memref<9x144x256xbf16, #tpu.memory_space<vmem>>, vector<1x144x256xbf16>
    %82 = vector.shape_cast %81 : vector<1x144x256xbf16> to vector<144x256xbf16>
    %cst_67 = arith.constant dense<0.000000e+00> : vector<2x256xf32>
    %83 = tpu.matmul %80, %82, %cst_67 {dimension_numbers = #tpu.dot_dimension_numbers<[1], [0], [0], [1], [0, 0, 1, 1], [], []>} : vector<2x144xbf16>, vector<144x256xbf16>, vector<2x256xf32> -> vector<2x256xf32>
    %84 = arith.addf %79, %83 : vector<2x256xf32>
    %85 = vector.extract_strided_slice %43 {offsets = [16, 0], sizes = [2, 144], strides = [1, 1]} : vector<18x144xbf16> to vector<2x144xbf16>
    %c8 = arith.constant 8 : index
    %c0_68 = arith.constant 0 : index
    %c0_69 = arith.constant 0 : index
    %86 = vector.load %arg4[%c8, %c0_68, %c0_69] : memref<9x144x256xbf16, #tpu.memory_space<vmem>>, vector<1x144x256xbf16>
    %87 = vector.shape_cast %86 : vector<1x144x256xbf16> to vector<144x256xbf16>
    %cst_70 = arith.constant dense<0.000000e+00> : vector<2x256xf32>
    %88 = tpu.matmul %85, %87, %cst_70 {dimension_numbers = #tpu.dot_dimension_numbers<[1], [0], [0], [1], [0, 0, 1, 1], [], []>} : vector<2x144xbf16>, vector<144x256xbf16>, vector<2x256xf32> -> vector<2x256xf32>
    %89 = arith.addf %84, %88 : vector<2x256xf32>
    %c0_71 = arith.constant 0 : index
    %c0_72 = arith.constant 0 : index
    %90 = vector.load %arg5[%c0_71, %c0_72] : memref<1x256xf32, #tpu.memory_space<vmem>>, vector<1x256xf32>
    %91 = vector.broadcast %90 : vector<1x256xf32> to vector<2x256xf32>
    %92 = arith.addf %89, %91 : vector<2x256xf32>
    %cst_73 = arith.constant 0.000000e+00 : f32
    %93 = vector.broadcast %cst_73 : f32 to vector<2x256xf32>
    %94 = arith.maximumf %92, %93 : vector<2x256xf32>
    %c0_74 = arith.constant 0 : index
    %c0_75 = arith.constant 0 : index
    %95 = vector.load %arg6[%c0_74, %c0_75] : memref<1x256xf32, #tpu.memory_space<vmem>>, vector<1x256xf32>
    %96 = vector.broadcast %95 : vector<1x256xf32> to vector<2x256xf32>
    %97 = arith.mulf %94, %96 : vector<2x256xf32>
    %cst_76 = arith.constant dense<0.000000e+00> : vector<2xf32>
    %98 = vector.multi_reduction <add>, %97, %cst_76 [1] : vector<2x256xf32> to vector<2xf32>
    %99 = vector.shape_cast %98 : vector<2xf32> to vector<2x1xf32>
    %c0_77 = arith.constant 0 : index
    %c0_78 = arith.constant 0 : index
    %100 = vector.load %arg7[%c0_77, %c0_78] : memref<1x1xf32, #tpu.memory_space<vmem>>, vector<1x1xf32>
    %101 = vector.broadcast %100 : vector<1x1xf32> to vector<2x1xf32>
    %102 = arith.addf %99, %101 : vector<2x1xf32>
    %103 = arith.negf %102 : vector<2x1xf32>
    %104 = math.exp %103 : vector<2x1xf32>
    %cst_79 = arith.constant 1.000000e+00 : f32
    %105 = vector.broadcast %cst_79 : f32 to vector<2x1xf32>
    %106 = arith.addf %105, %104 : vector<2x1xf32>
    %107 = arith.divf %105, %106 : vector<2x1xf32>
    %c0_80 = arith.constant 0 : index
    %c0_81 = arith.constant 0 : index
    %108 = vector.load %arg8[%c0_80, %c0_81] : memref<2x1xf32, #tpu.memory_space<vmem>>, vector<2x1xf32>
    tpu.vector_store %arg8[%c0_80, %c0_81], %107 {strides = array<i32>} : memref<2x1xf32, #tpu.memory_space<vmem>>, vector<2x1xf32>,
    return
  }
}

</mosaic_0001>

<bundles_post_ra>
// kernel: policy_forward.1
= control target key start
LH: loop header
LB: loop body
LE: loop exit
PB: predicated region body
PF: predicated region fallthrough
CT: control target
= control target key end

     0   :  { %vm987_vm0 = vcmask 523264   ;;  %vm1415_vm1 = vcmask 1043456   ;;  %vm1416_vm2 = vcmask 195588   ;;  %vm1590_vm4 = vcmask 195584   ;;  %s7143_s1 = inlined_call_operand.vmem [shape: bf16[960,152], index: 1, kind: input, shape index: {}]   ;;  %s7144_s0 = inlined_call_operand.vmem [shape: bf16[80,960], index: 0, kind: input, shape index: {}]   ;;  %s7145_s2 = inlined_call_operand.vmem [shape: bf16[6,152,144], index: 2, kind: input, shape index: {}]   ;;  %s7146_s4 = inlined_call_operand.vmem [shape: bf16[9,144,256], index: 4, kind: input, shape index: {}]   ;;  %s7147_s3 = inlined_call_operand.vmem [shape: f32[1,144], index: 3, kind: input, shape index: {}]   ;;  %s7148_s7 = inlined_call_operand.<no memory space> [shape: f32[1,1], index: 7, kind: input, shape index: {}]   ;;  %s7149_s5 = inlined_call_operand.vmem [shape: f32[1,256], index: 5, kind: input, shape index: {}]   ;;  %s7150_s6 = inlined_call_operand.vmem [shape: f32[1,256], index: 6, kind: input, shape index: {}]   ;;  %s7151_s8 = inlined_call_operand.vmem [shape: f32[2,1], index: 8, kind: output, shape index: {}]  }
   0x1   :  { %v4904_v0 = vld [vmem:[%s7143_s1 + $0x74] ss:$8 sps:$4 sm:$0xff]   ;;  %v4908_v2 = vld [vmem:[%s7143_s1 + $0x70] ss:$8 sps:$4 sm:$0xff]   ;;  %v4910_v4 = vld [vmem:[%s7143_s1 + $0x64] ss:$8 sps:$4 sm:$0xff]  }
   0x2   :  { %v4906_v1 = vld [vmem:[%s7143_s1 + $0x174] ss:$8 sps:$4 sm:$0xff]   ;;  %1003 = vmatprep.subr.bf16.mxu0 %v4904_v0  ;;  %v4909_v3 = vld [vmem:[%s7143_s1 + $0x170] ss:$8 sps:$4 sm:$0xff]   ;;  %v4912_v5 = vld [vmem:[%s7143_s1 + $0x164] ss:$8 sps:$4 sm:$0xff]  }
   0x3   :  { %1086 = vmatprep.subr.bf16.mxu1 %v4906_v1  ;;  %1004 = vmatpush1.bf16.msra.mxu0 %v4908_v2  ;;  %v4914_v6 = vld [vmem:[%s7143_s1 + $0x60] ss:$8 sps:$4 sm:$0xff]   ;;  %v4916_v8 = vld [vmem:[%s7143_s1 + $0x54] ss:$8 sps:$4 sm:$0xff]   ;;  %v4920_v10 = vld [vmem:[%s7143_s1 + $0x50] ss:$8 sps:$4 sm:$0xff]  }
   0x4   :  { %1087 = vmatpush1.bf16.msra.mxu1 %v4909_v3  ;;  %1005 = vmatprep.subr.bf16.mxu0 %v4910_v4  ;;  %v4915_v7 = vld [vmem:[%s7143_s1 + $0x160] ss:$8 sps:$4 sm:$0xff]   ;;  %v4918_v9 = vld [vmem:[%s7143_s1 + $0x154] ss:$8 sps:$4 sm:$0xff]   ;;  %v4921_v11 = vld [vmem:[%s7143_s1 + $0x150] ss:$8 sps:$4 sm:$0xff]  }
   0x5   :  { %1088 = vmatprep.subr.bf16.mxu1 %v4912_v5  ;;  %v4922_v12 = vld [vmem:[%s7143_s1 + $0x44] ss:$8 sps:$4 sm:$0xff]   ;;  %v4926_v14 = vld [vmem:[%s7143_s1 + $0x40] ss:$8 sps:$4 sm:$0xff]   ;;  %v4928_v16 = vld [vmem:[%s7143_s1 + $0x34] ss:$8 sps:$4 sm:$0xff]  }
   0x6   :  { %v4924_v13 = vld [vmem:[%s7143_s1 + $0x144] ss:$8 sps:$4 sm:$0xff]   ;;  %v4927_v15 = vld [vmem:[%s7143_s1 + $0x140] ss:$8 sps:$4 sm:$0xff]   ;;  %v4930_v17 = vld [vmem:[%s7143_s1 + $0x134] ss:$8 sps:$4 sm:$0xff]  }
   0x7   :  { %1006 = vmatpush1.bf16.msra.mxu0 %v4914_v6  ;;  %v4932_v18 = vld [vmem:[%s7143_s1 + $0x30] ss:$8 sps:$4 sm:$0xff]   ;;  %v4934_v20 = vld [vmem:[%s7143_s1 + $0x24] ss:$8 sps:$4 sm:$0xff]   ;;  %v4938_v22 = vld [vmem:[%s7143_s1 + $0x20] ss:$8 sps:$4 sm:$0xff]  }
   0x8   :  { %1089 = vmatpush1.bf16.msra.mxu1 %v4915_v7  ;;  %1007 = vmatprep.subr.bf16.mxu0 %v4916_v8  ;;  %v4933_v19 = vld [vmem:[%s7143_s1 + $0x130] ss:$8 sps:$4 sm:$0xff]   ;;  %v4936_v21 = vld [vmem:[%s7143_s1 + $0x124] ss:$8 sps:$4 sm:$0xff]   ;;  %v4939_v23 = vld [vmem:[%s7143_s1 + $0x120] ss:$8 sps:$4 sm:$0xff]  }
   0x9   :  { %1090 = vmatprep.subr.bf16.mxu1 %v4918_v9  ;;  %v4940_v24 = vld [vmem:[%s7143_s1 + $0x14] ss:$8 sps:$4 sm:$0xff]   ;;  %v4944_v26 = vld [vmem:[%s7143_s1 + $0x10] ss:$8 sps:$4 sm:$0xff]   ;;  %v4946_v28 = vld [vmem:[%s7143_s1 + $0x4] ss:$8 sps:$4 sm:$0xff]  }
   0xa   :  { %v4942_v25 = vld [vmem:[%s7143_s1 + $0x114] ss:$8 sps:$4 sm:$0xff]   ;;  %v4945_v27 = vld [vmem:[%s7143_s1 + $0x110] ss:$8 sps:$4 sm:$0xff]   ;;  %v4948_v29 = vld [vmem:[%s7143_s1 + $0x104] ss:$8 sps:$4 sm:$0xff]  }
   0xb   :  { %1008 = vmatpush1.bf16.msra.mxu0 %v4920_v10  ;;  %v4950_v30 = vld [vmem:[%s7143_s1] ss:$8 sps:$4 sm:$0xff]   ;;  %v4952_v32 = vld [vmem:[%s7143_s1 + $0xf4] ss:$8 sps:$4 sm:$0xff]   ;;  %v4956_v34 = vld [vmem:[%s7143_s1 + $0xf0] ss:$8 sps:$4 sm:$0xff]  }
   0xc   :  { %1091 = vmatpush1.bf16.msra.mxu1 %v4921_v11  ;;  %1009 = vmatprep.subr.bf16.mxu0 %v4922_v12  ;;  %v4951_v31 = vld [vmem:[%s7143_s1 + $0x100] ss:$8 sps:$4 sm:$0xff]   ;;  %v4954_v33 = vld [vmem:[%s7143_s1 + $0x1f4] ss:$8 sps:$4 sm:$0xff]   ;;  %v4957_v35 = vld [vmem:[%s7143_s1 + $0x1f0] ss:$8 sps:$4 sm:$0xff]  }
   0xd   :  { %1092 = vmatprep.subr.bf16.mxu1 %v4924_v13  ;;  %v4958_v36 = vld [vmem:[%s7143_s1 + $0xe4] ss:$8 sps:$4 sm:$0xff]   ;;  %v4962_v38 = vld [vmem:[%s7143_s1 + $0xe0] ss:$8 sps:$4 sm:$0xff]   ;;  %v4964_v40 = vld [vmem:[%s7143_s1 + $0xd4] ss:$8 sps:$4 sm:$0xff]  }
   0xe   :  { %v4960_v37 = vld [vmem:[%s7143_s1 + $0x1e4] ss:$8 sps:$4 sm:$0xff]   ;;  %v4963_v39 = vld [vmem:[%s7143_s1 + $0x1e0] ss:$8 sps:$4 sm:$0xff]   ;;  %v4966_v41 = vld [vmem:[%s7143_s1 + $0x1d4] ss:$8 sps:$4 sm:$0xff]  }
   0xf   :  { %1010 = vmatpush1.bf16.msra.mxu0 %v4926_v14  ;;  %v4968_v42 = vld [vmem:[%s7143_s1 + $0xd0] ss:$8 sps:$4 sm:$0xff]   ;;  %v4970_v44 = vld [vmem:[%s7143_s1 + $0xc4] ss:$8 sps:$4 sm:$0xff]   ;;  %v4974_v46 = vld [vmem:[%s7143_s1 + $0xc0] ss:$8 sps:$4 sm:$0xff]  }
  0x10   :  { %1093 = vmatpush1.bf16.msra.mxu1 %v4927_v15  ;;  %1011 = vmatprep.subr.bf16.mxu0 %v4928_v16  ;;  %v4969_v43 = vld [vmem:[%s7143_s1 + $0x1d0] ss:$8 sps:$4 sm:$0xff]   ;;  %v4972_v45 = vld [vmem:[%s7143_s1 + $0x1c4] ss:$8 sps:$4 sm:$0xff]   ;;  %v4975_v47 = vld [vmem:[%s7143_s1 + $0x1c0] ss:$8 sps:$4 sm:$0xff]  }
  0x11   :  { %1094 = vmatprep.subr.bf16.mxu1 %v4930_v17  ;;  %v32_v48 = vld [vmem:[%s7144_s0] sm:$0xff]  ;;  %v33_v50 = vld [vmem:[%s7144_s0 + $0x8] sm:$0xff]  ;;  %v4976_v52 = vld [vmem:[%s7143_s1 + $0xb4] ss:$8 sps:$4 sm:$0xff]   ;;  %vm1486_vm5 = vcmask 1045504   ;;  %vm2474_vm6 = vcmask 1044480  }
  0x12   :  { %v36_v49 = vld [vmem:[%s7144_s0 + $0x20] sm:$0xff]  ;;  %v37_v51 = vld [vmem:[%s7144_s0 + $0x28] sm:$0xff]  ;;  %v4978_v54 = vld [vmem:[%s7143_s1 + $0x1b4] ss:$8 sps:$4 sm:$0xff]   ;;  %vm2269_vm7 = vcmask 1046528   ;;  %vm2807_vm8 = vcmask 130048  }
  0x13   :  { %1012 = vmatpush1.bf16.msra.mxu0 %v4932_v18  ;;  %v4146_v53 = vcombine.high %v32_v48, %v36_v49  ;;  %v4148_v55 = vcombine.high %v33_v50, %v37_v51  ;;  %v4980_v56 = vld [vmem:[%s7143_s1 + $0xb0] ss:$8 sps:$4 sm:$0xff]   ;;  %v4982_v58 = vld [vmem:[%s7143_s1 + $0xa4] ss:$8 sps:$4 sm:$0xff]   ;;  %v4986_v60 = vld [vmem:[%s7143_s1 + $0xa0] ss:$8 sps:$4 sm:$0xff]   ;;  %v4145_v11 = vcombine.low %v32_v48, %v36_v49  ;;  %v4147_v12 = vcombine.low %v33_v50, %v37_v51 }
  0x14   :  { %1095 = vmatpush1.bf16.msra.mxu1 %v4933_v19  ;;  %1013 = vmatprep.subr.bf16.mxu0 %v4934_v20  ;;  %v4981_v57 = vld [vmem:[%s7143_s1 + $0x1b0] ss:$8 sps:$4 sm:$0xff]   ;;  %v4984_v59 = vld [vmem:[%s7143_s1 + $0x1a4] ss:$8 sps:$4 sm:$0xff]   ;;  %v4987_v61 = vld [vmem:[%s7143_s1 + $0x1a0] ss:$8 sps:$4 sm:$0xff]  }
  0x15   :  { %1096 = vmatprep.subr.bf16.mxu1 %v4936_v21  ;;  %1035 = vmatprep.mubr.bf16.mxu0 %v4146_v53  ;;  %v4988_v62 = vld [vmem:[%s7143_s1 + $0x94] ss:$8 sps:$4 sm:$0xff]   ;;  %v4992_v0 = vld [vmem:[%s7143_s1 + $0x90] ss:$8 sps:$4 sm:$0xff]   ;;  %v4994_v2 = vld [vmem:[%s7143_s1 + $0x84] ss:$8 sps:$4 sm:$0xff]  }
  0x16   :  { %1118 = vmatprep.mubr.bf16.mxu1 %v4148_v55  ;;  %v4990_v63 = vld [vmem:[%s7143_s1 + $0x194] ss:$8 sps:$4 sm:$0xff]   ;;  %v4993_v1 = vld [vmem:[%s7143_s1 + $0x190] ss:$8 sps:$4 sm:$0xff]   ;;  %v4996_v3 = vld [vmem:[%s7143_s1 + $0x184] ss:$8 sps:$4 sm:$0xff]  }
  0x17   :  { %1014 = vmatpush1.bf16.msra.mxu0 %v4938_v22  ;;  %v4998_v4 = vld [vmem:[%s7143_s1 + $0x80] ss:$8 sps:$4 sm:$0xff]   ;;  %v5002_v6 = vld [vmem:[%s7143_s1 + $0x274] ss:$8 sps:$4 sm:$0xff]   ;;  %v5000_v8 = vld [vmem:[%s7143_s1 + $0x270] ss:$8 sps:$4 sm:$0xff]  }
  0x18   :  { %1097 = vmatpush1.bf16.msra.mxu1 %v4939_v23  ;;  %1015 = vmatprep.subr.bf16.mxu0 %v4940_v24  ;;  %v4999_v5 = vld [vmem:[%s7143_s1 + $0x180] ss:$8 sps:$4 sm:$0xff]   ;;  %v5014_v7 = vld [vmem:[%s7143_s1 + $0x374] ss:$8 sps:$4 sm:$0xff]   ;;  %v5012_v15 = vld [vmem:[%s7143_s1 + $0x370] ss:$8 sps:$4 sm:$0xff]  }
  0x19   :  { %1098 = vmatprep.subr.bf16.mxu1 %v4942_v25  ;;  %v40_v9 = vld [vmem:[%s7144_s0 + $0x40] sm:$0xff]  ;;  %v41_v13 = vld [vmem:[%s7144_s0 + $0x48] sm:$0xff]  ;;  %v5008_v21 = vld [vmem:[%s7143_s1 + $0x254] ss:$8 sps:$4 sm:$0xff]   ;;  %vm4119_vm9 = vcmask 1041408   ;;  %vm4139_vm10 = vcmask 1024  }
  0x1a   :  { %v44_v10 = vld [vmem:[%s7144_s0 + $0x60] sm:$0xff]  ;;  %v45_v14 = vld [vmem:[%s7144_s0 + $0x68] sm:$0xff]  ;;  %v5026_v23 = vld [vmem:[%s7143_s1 + $0x354] ss:$8 sps:$4 sm:$0xff]  }
  0x1b   :  { %1016 = vmatpush1.bf16.msra.mxu0 %v4944_v26  ;;  %v5005_v16 = vld [vmem:[%s7143_s1 + $0x264] ss:$8 sps:$4 sm:$0xff]   ;;  %v4154_v18 = vcombine.high %v40_v9, %v44_v10  ;;  %v4156_v19 = vcombine.high %v41_v13, %v45_v14  ;;  %v5003_v20 = vld [vmem:[%s7143_s1 + $0x260] ss:$8 sps:$4 sm:$0xff]   ;;  %v4153_v26 = vcombine.low %v40_v9, %v44_v10  ;;  %v5036_v48 = vld [vmem:[%s7143_s1 + $0x330] ss:$8 sps:$4 sm:$0xff]  }
  0x1c   :  { %1099 = vmatpush1.bf16.msra.mxu1 %v4945_v27  ;;  %1017 = vmatprep.subr.bf16.mxu0 %v4946_v28  ;;  %v5020_v17 = vld [vmem:[%s7143_s1 + $0x364] ss:$8 sps:$4 sm:$0xff]   ;;  %v5018_v22 = vld [vmem:[%s7143_s1 + $0x360] ss:$8 sps:$4 sm:$0xff]   ;;  %v4155_v27 = vcombine.low %v41_v13, %v45_v14  ;;  %v5050_v55 = vld [vmem:[%s7143_s1 + $0x314] ss:$8 sps:$4 sm:$0xff]  }
  0x1d   :  { %1100 = vmatprep.subr.bf16.mxu1 %v4948_v29  ;;  %v48_v24 = vld [vmem:[%s7144_s0 + $0x80] sm:$0xff]  ;;  %v49_v28 = vld [vmem:[%s7144_s0 + $0x88] sm:$0xff]  ;;  %v5940_v13 = vld [vmem:[%s7144_s0 + $0x30] sm:$0xff] }
  0x1e   :  { %v52_v25 = vld [vmem:[%s7144_s0 + $0xa0] sm:$0xff]  ;;  %v53_v29 = vld [vmem:[%s7144_s0 + $0xa8] sm:$0xff]  ;;  %v5039_v14 = vld [vmem:[%s7143_s1 + $0x2f0] ss:$8 sps:$4 sm:$0xff]  }
  0x1f   :  { %1018 = vmatpush1.bf16.msra.mxu0 %v4950_v30  ;;  %v5006_v30 = vld [vmem:[%s7143_s1 + $0x250] ss:$8 sps:$4 sm:$0xff]   ;;  %v5044_v49 = vld [vmem:[%s7143_s1 + $0x324] ss:$8 sps:$4 sm:$0xff]   ;;  %v5042_v53 = vld [vmem:[%s7143_s1 + $0x320] ss:$8 sps:$4 sm:$0xff]  }
  0x20   :  { %1101 = vmatpush1.bf16.msra.mxu1 %v4951_v31  ;;  %1019 = vmatprep.subr.bf16.mxu0 %v4952_v32  ;;  %v5011_v31 = vld [vmem:[%s7143_s1 + $0x244] ss:$8 sps:$4 sm:$0xff]   ;;  %v5024_v32 = vld [vmem:[%s7143_s1 + $0x350] ss:$8 sps:$4 sm:$0xff]   ;;  %vm6250_vm3 = vmor %vm1416_vm2, %vm1415_vm1 }
  0x21   :  { %1102 = vmatprep.subr.bf16.mxu1 %v4954_v33  ;;  %v5032_v33 = vld [vmem:[%s7143_s1 + $0x344] ss:$8 sps:$4 sm:$0xff]  }
  0x23   :  { %1020 = vmatpush2.bf16.msra.mxu0 %v4956_v34  ;;  %v4162_v34 = vcombine.high %v48_v24, %v52_v25 }
  0x24   :  { %1103 = vmatpush2.bf16.msra.mxu1 %v4957_v35  ;;  %1021 = vmatprep.subr.bf16.mxu0 %v4958_v36  ;;  %v4164_v35 = vcombine.high %v49_v28, %v53_v29  ;;  %v5009_v36 = vld [vmem:[%s7143_s1 + $0x240] ss:$8 sps:$4 sm:$0xff]  }
  0x25   :  { %1104 = vmatprep.subr.bf16.mxu1 %v4960_v37  ;;  %v5017_v37 = vld [vmem:[%s7143_s1 + $0x234] ss:$8 sps:$4 sm:$0xff]  }
  0x27   :  { %1022 = vmatpush2.bf16.msra.mxu0 %v4962_v38  ;;  %v5030_v38 = vld [vmem:[%s7143_s1 + $0x340] ss:$8 sps:$4 sm:$0xff]  }
  0x28   :  { %1105 = vmatpush2.bf16.msra.mxu1 %v4963_v39  ;;  %1023 = vmatprep.subr.bf16.mxu0 %v4964_v40  ;;  %v5038_v39 = vld [vmem:[%s7143_s1 + $0x334] ss:$8 sps:$4 sm:$0xff]   ;;  %v5015_v40 = vld [vmem:[%s7143_s1 + $0x230] ss:$8 sps:$4 sm:$0xff]  }
  0x29   :  { %1106 = vmatprep.subr.bf16.mxu1 %v4966_v41  ;;  %v56_v41 = vld [vmem:[%s7144_s0 + $0xc0] sm:$0xff] }
  0x2b   :  { %1024 = vmatpush2.bf16.msra.mxu0 %v4968_v42  ;;  %v5023_v42 = vld [vmem:[%s7143_s1 + $0x224] ss:$8 sps:$4 sm:$0xff]  }
  0x2c   :  { %1107 = vmatpush2.bf16.msra.mxu1 %v4969_v43  ;;  %1025 = vmatprep.subr.bf16.mxu0 %v4970_v44  ;;  %v4161_v43 = vcombine.low %v48_v24, %v52_v25  ;;  %v4163_v44 = vcombine.low %v49_v28, %v53_v29  ;;  %v5051_v24 = vld [vmem:[%s7143_s1 + $0x2d0] ss:$8 sps:$4 sm:$0xff]   ;;  %v5057_v28 = vld [vmem:[%s7143_s1 + $0x2c0] ss:$8 sps:$4 sm:$0xff]  }
  0x2d   :  { %1108 = vmatprep.subr.bf16.mxu1 %v4972_v45  ;;  %v60_v45 = vld [vmem:[%s7144_s0 + $0xe0] sm:$0xff]  ;;  %v5072_v25 = vld [vmem:[%s7143_s1 + $0x390] ss:$8 sps:$4 sm:$0xff]  }
  0x2e   :  { %v4170_v50 = vcombine.high %v56_v41, %v60_v45  ;;  %v5078_v29 = vld [vmem:[%s7143_s1 + $0x380] ss:$8 sps:$4 sm:$0xff]  }
  0x2f   :  { %1026 = vmatpush2.bf16.msra.mxu0 %v4974_v46  ;;  %v57_v46 = vld [vmem:[%s7144_s0 + $0xc8] sm:$0xff] }
  0x30   :  { %1109 = vmatpush2.bf16.msra.mxu1 %v4975_v47  ;;  %1027 = vmatprep.subr.bf16.mxu0 %v4976_v52  ;;  %v61_v47 = vld [vmem:[%s7144_s0 + $0xe8] sm:$0xff] }
  0x31   :  { %1110 = vmatprep.subr.bf16.mxu1 %v4978_v54  ;;  %v4172_v51 = vcombine.high %v57_v46, %v61_v47  ;;  %v5021_v52 = vld [vmem:[%s7143_s1 + $0x220] ss:$8 sps:$4 sm:$0xff]   ;;  %v5029_v54 = vld [vmem:[%s7143_s1 + $0x214] ss:$8 sps:$4 sm:$0xff]  }
  0x33   :  { %1028 = vmatpush2.bf16.msra.mxu0 %v4980_v56  ;;  %v64_v56 = vld [vmem:[%s7144_s0 + $0x100] sm:$0xff] }
  0x34   :  { %1111 = vmatpush2.bf16.msra.mxu1 %v4981_v57  ;;  %1029 = vmatprep.subr.bf16.mxu0 %v4982_v58  ;;  %v4169_v57 = vcombine.low %v56_v41, %v60_v45  ;;  %v4171_v58 = vcombine.low %v57_v46, %v61_v47  ;;  %v5081_v45 = vld [vmem:[%s7143_s1 + $0x280] ss:$8 sps:$4 sm:$0xff]   ;;  %v42_v46 = vld [vmem:[%s7144_s0 + $0x50] sm:$0xff] }
  0x35   :  { %1112 = vmatprep.subr.bf16.mxu1 %v4984_v59  ;;  %v68_v59 = vld [vmem:[%s7144_s0 + $0x120] sm:$0xff]  ;;  %v46_v47 = vld [vmem:[%s7144_s0 + $0x70] sm:$0xff] }
  0x36   :  { %v4177_v9 = vcombine.low %v64_v56, %v68_v59 }
  0x37   :  { %1030 = vmatpush2.bf16.msra.mxu0 %v4986_v60  ;;  %v65_v60 = vld [vmem:[%s7144_s0 + $0x108] sm:$0xff] }
  0x38   :  { %1113 = vmatpush2.bf16.msra.mxu1 %v4987_v61  ;;  %1031 = vmatprep.subr.bf16.mxu0 %v4988_v62  ;;  %v69_v61 = vld [vmem:[%s7144_s0 + $0x128] sm:$0xff]  ;;  %v5027_v62 = vld [vmem:[%s7143_s1 + $0x210] ss:$8 sps:$4 sm:$0xff]  }
  0x39   :  { %1114 = vmatprep.subr.bf16.mxu1 %v4990_v63  ;;  %v5048_v63 = vld [vmem:[%s7143_s1 + $0x310] ss:$8 sps:$4 sm:$0xff]   ;;  %v4179_v10 = vcombine.low %v65_v60, %v69_v61 }
  0x3b   :  { %1032 = vmatpush2.bf16.msra.mxu0 %v4992_v0  ;;  %v5035_v0 = vld [vmem:[%s7143_s1 + $0x204] ss:$8 sps:$4 sm:$0xff]  }
  0x3c   :  { %1115 = vmatpush2.bf16.msra.mxu1 %v4993_v1  ;;  %1033 = vmatprep.subr.bf16.mxu0 %v4994_v2  ;;  %v5056_v1 = vld [vmem:[%s7143_s1 + $0x304] ss:$8 sps:$4 sm:$0xff]   ;;  %v4178_v2 = vcombine.high %v64_v56, %v68_v59  ;;  %v67_v56 = vld [vmem:[%s7144_s0 + $0x118] sm:$0xff] }
  0x3d   :  { %1116 = vmatprep.subr.bf16.mxu1 %v4996_v3  ;;  %v4180_v3 = vcombine.high %v65_v60, %v69_v61 }
  0x3f   :  { %1034 = vmatpush2.bf16.msra.mxu0 %v4998_v4  ;;  %v5033_v4 = vld [vmem:[%s7143_s1 + $0x200] ss:$8 sps:$4 sm:$0xff]  }
  0x40   :  { %1117 = vmatpush2.bf16.msra.mxu1 %v4999_v5  ;;  %1169 = vmatprep.subr.bf16.mxu0 %v5002_v6  ;;  %v5054_v5 = vld [vmem:[%s7143_s1 + $0x300] ss:$8 sps:$4 sm:$0xff]   ;;  %v5041_v6 = vld [vmem:[%s7143_s1 + $0x2f4] ss:$8 sps:$4 sm:$0xff]  }
  0x41   :  { %1252 = vmatprep.subr.bf16.mxu1 %v5014_v7  ;;  %v5062_v7 = vld [vmem:[%s7143_s1 + $0x3b4] ss:$8 sps:$4 sm:$0xff]  }
  0x42   :  { %1036 = vmatmul.mubr.bf16.vlgmr.msra.gmra.mxu0 %v4145_v11  ;;  %v39_v11 = vld [vmem:[%s7144_s0 + $0x38] sm:$0xff] }
  0x43   :  { %1119 = vmatmul.mubr.bf16.vlgmr.msra.gmra.mxu1 %v4147_v12  ;;  %1170 = vmatpush1.bf16.msra.mxu0 %v5000_v8  ;;  %v35_v8 = vld [vmem:[%s7144_s0 + $0x18] sm:$0xff]  ;;  %v5935_v12 = vld [vmem:[%s7144_s0 + $0x10] sm:$0xff] }
  0x44   :  { %1253 = vmatpush1.bf16.msra.mxu1 %v5012_v15  ;;  %1171 = vmatprep.subr.bf16.mxu0 %v5005_v16  ;;  %v5060_v15 = vld [vmem:[%s7143_s1 + $0x3b0] ss:$8 sps:$4 sm:$0xff]   ;;  %v5047_v16 = vld [vmem:[%s7143_s1 + $0x2e4] ss:$8 sps:$4 sm:$0xff]  }
  0x45   :  { %1254 = vmatprep.subr.bf16.mxu1 %v5020_v17  ;;  %1045 = vmatprep.mubr.bf16.mxu0 %v4154_v18  ;;  %v5068_v17 = vld [vmem:[%s7143_s1 + $0x3a4] ss:$8 sps:$4 sm:$0xff]   ;;  %v4152_v18 = vcombine.high %v35_v8, %v39_v11 }
  0x46   :  { %1128 = vmatprep.mubr.bf16.mxu1 %v4156_v19  ;;  %v4150_v19 = vcombine.high %v5935_v12, %v5940_v13 }
  0x47   :  { %1172 = vmatpush1.bf16.msra.mxu0 %v5003_v20  ;;  %v5045_v20 = vld [vmem:[%s7143_s1 + $0x2e0] ss:$8 sps:$4 sm:$0xff]  }
  0x48   :  { %1255 = vmatpush1.bf16.msra.mxu1 %v5018_v22  ;;  %1173 = vmatprep.subr.bf16.mxu0 %v5008_v21  ;;  %v5066_v21 = vld [vmem:[%s7143_s1 + $0x3a0] ss:$8 sps:$4 sm:$0xff]   ;;  %v5053_v22 = vld [vmem:[%s7143_s1 + $0x2d4] ss:$8 sps:$4 sm:$0xff]  }
  0x49   :  { %1256 = vmatprep.subr.bf16.mxu1 %v5026_v23  ;;  %v5074_v23 = vld [vmem:[%s7143_s1 + $0x394] ss:$8 sps:$4 sm:$0xff]  }
  0x4a   :  { %1046 = vmatmul.mubr.bf16.gmra.mxu0 %v4153_v26  ;;  %v5059_v26 = vld [vmem:[%s7143_s1 + $0x2c4] ss:$8 sps:$4 sm:$0xff]  }
  0x4b   :  { %1129 = vmatmul.mubr.bf16.gmra.mxu1 %v4155_v27  ;;  %1174 = vmatpush1.bf16.msra.mxu0 %v5006_v30  ;;  %v5080_v27 = vld [vmem:[%s7143_s1 + $0x384] ss:$8 sps:$4 sm:$0xff]   ;;  %v5065_v30 = vld [vmem:[%s7143_s1 + $0x2b4] ss:$8 sps:$4 sm:$0xff]  }
  0x4c   :  { %1257 = vmatpush1.bf16.msra.mxu1 %v5024_v32  ;;  %1175 = vmatprep.subr.bf16.mxu0 %v5011_v31  ;;  %v43_v31 = vld [vmem:[%s7144_s0 + $0x58] sm:$0xff] }
  0x4d   :  { %1258 = vmatprep.subr.bf16.mxu1 %v5032_v33  ;;  %1055 = vmatprep.mubr.bf16.mxu0 %v4162_v34  ;;  %v47_v32 = vld [vmem:[%s7144_s0 + $0x78] sm:$0xff]  ;;  %v4151_v33 = vcombine.low %v35_v8, %v39_v11  ;;  %v5089_v11 = vld [vmem:[%s7145_s2 + $0x64] ss:$8 sps:$4 sm:$0xff]  }
  0x4e   :  { %1138 = vmatprep.mubr.bf16.mxu1 %v4164_v35  ;;  %v5063_v34 = vld [vmem:[%s7143_s1 + $0x2b0] ss:$8 sps:$4 sm:$0xff]   ;;  %v4160_v35 = vcombine.high %v43_v31, %v47_v32  ;;  %v4159_v41 = vcombine.low %v43_v31, %v47_v32  ;;  %v5117_v31 = vld [vmem:[%s7145_s2] ss:$8 sps:$4 sm:$0xff]   ;;  %v5122_v32 = vld [vmem:[%s7145_s2 + $0xcc] ss:$8 sps:$4 sm:$0xff]  }
  0x4f   :  { %1176 = vmatpush1.bf16.msra.mxu0 %v5009_v36  ;;  %v5071_v36 = vld [vmem:[%s7143_s1 + $0x2a4] ss:$8 sps:$4 sm:$0xff]   ;;  %v5084_v8 = vld [vmem:[%s7145_s2 + $0x70] ss:$8 sps:$4 sm:$0xff]  }
  0x50   :  { %1259 = vmatpush1.bf16.msra.mxu1 %v5030_v38  ;;  %1177 = vmatprep.subr.bf16.mxu0 %v5017_v37  ;;  %v5069_v37 = vld [vmem:[%s7143_s1 + $0x2a0] ss:$8 sps:$4 sm:$0xff]   ;;  %v5077_v38 = vld [vmem:[%s7143_s1 + $0x294] ss:$8 sps:$4 sm:$0xff]  }
  0x51   :  { %1260 = vmatprep.subr.bf16.mxu1 %v5038_v39  ;;  %v51_v39 = vld [vmem:[%s7144_s0 + $0x98] sm:$0xff] }
  0x52   :  { %1056 = vmatmul.mubr.bf16.gmra.mxu0 %v4161_v43 }
  0x53   :  { %1139 = vmatmul.mubr.bf16.gmra.mxu1 %v4163_v44  ;;  %1178 = vmatpush1.bf16.msra.mxu0 %v5015_v40  ;;  %v55_v40 = vld [vmem:[%s7144_s0 + $0xb8] sm:$0xff]  ;;  %v5083_v44 = vld [vmem:[%s7143_s1 + $0x284] ss:$8 sps:$4 sm:$0xff]  }
  0x54   :  { %1261 = vmatpush1.bf16.msra.mxu1 %v5036_v48  ;;  %1179 = vmatprep.subr.bf16.mxu0 %v5023_v42  ;;  %v5075_v42 = vld [vmem:[%s7143_s1 + $0x290] ss:$8 sps:$4 sm:$0xff]   ;;  %v4168_v43 = vcombine.high %v51_v39, %v55_v40 }
  0x55   :  { %1262 = vmatprep.subr.bf16.mxu1 %v5044_v49  ;;  %1065 = vmatprep.mubr.bf16.mxu0 %v4170_v50  ;;  %v59_v48 = vld [vmem:[%s7144_s0 + $0xd8] sm:$0xff]  ;;  %v4149_v50 = vcombine.low %v5935_v12, %v5940_v13 }
  0x56   :  { %1148 = vmatprep.mubr.bf16.mxu1 %v4172_v51  ;;  %v63_v49 = vld [vmem:[%s7144_s0 + $0xf8] sm:$0xff]  ;;  %v4167_v51 = vcombine.low %v51_v39, %v55_v40  ;;  %v5129_v40 = vld [vmem:[%s7145_s2 + $0x84] ss:$8 sps:$4 sm:$0xff]  }
  0x57   :  { %1180 = vmatpush1.bf16.msra.mxu0 %v5021_v52  ;;  %v4158_v52 = vcombine.high %v42_v46, %v46_v47  ;;  %v4175_v59 = vcombine.low %v59_v48, %v63_v49  ;;  %v5090_v12 = vld [vmem:[%s7145_s2 + $0x50] ss:$8 sps:$4 sm:$0xff]   ;;  %v5092_v13 = vld [vmem:[%s7145_s2 + $0x54] ss:$8 sps:$4 sm:$0xff]  }
  0x58   :  { %1263 = vmatpush1.bf16.msra.mxu1 %v5042_v53  ;;  %1181 = vmatprep.subr.bf16.mxu0 %v5029_v54  ;;  %v4176_v53 = vcombine.high %v59_v48, %v63_v49  ;;  %v50_v54 = vld [vmem:[%s7144_s0 + $0x90] sm:$0xff]  ;;  %v5124_v39 = vld [vmem:[%s7145_s2 + $0xb8] ss:$8 sps:$4 sm:$0xff]  }
  0x59   :  { %1264 = vmatprep.subr.bf16.mxu1 %v5050_v55  ;;  %v54_v55 = vld [vmem:[%s7144_s0 + $0xb0] sm:$0xff] }
  0x5a   :  { %1066 = vmatmul.mubr.bf16.gmra.mxu0 %v4169_v57  ;;  %v71_v57 = vld [vmem:[%s7144_s0 + $0x138] sm:$0xff]  ;;  %v4166_v60 = vcombine.high %v50_v54, %v54_v55 }
  0x5b   :  { %1149 = vmatmul.mubr.bf16.gmra.mxu1 %v4171_v58  ;;  %1182 = vmatpush1.bf16.msra.mxu0 %v5027_v62  ;;  %v4157_v58 = vcombine.low %v42_v46, %v46_v47  ;;  %v4184_v61 = vcombine.high %v67_v56, %v71_v57  ;;  %v58_v62 = vld [vmem:[%s7144_s0 + $0xd0] sm:$0xff]  ;;  %v5138_v46 = vld [vmem:[%s7145_s2 + $0x98] ss:$8 sps:$4 sm:$0xff]   ;;  %v4338_v47 = vld [vmem:[%s7145_s2 + $0x128] sm:$0xff] }
  0x5c   :  { %1265 = vmatpush1.bf16.msra.mxu1 %v5048_v63  ;;  %1183 = vmatprep.subr.bf16.mxu0 %v5035_v0  ;;  %v62_v63 = vld [vmem:[%s7144_s0 + $0xf0] sm:$0xff]  ;;  %v4165_v0 = vcombine.low %v50_v54, %v54_v55  ;;  %v4362_v48 = vcombine.high %v4338_v47, %v4338_v47  ;;  %v4361_v49 = vcombine.low %v4338_v47, %v4338_v47 }
  0x5d   :  { %1266 = vmatprep.subr.bf16.mxu1 %v5056_v1  ;;  %1075 = vmatprep.mubr.bf16.mxu0 %v4178_v2  ;;  %v4183_v1 = vcombine.low %v67_v56, %v71_v57  ;;  %v4174_v2 = vcombine.high %v58_v62, %v62_v63 }
  0x5e   :  { %1158 = vmatprep.mubr.bf16.mxu1 %v4180_v3  ;;  %v66_v3 = vld [vmem:[%s7144_s0 + $0x110] sm:$0xff] }
  0x5f   :  { %1184 = vmatpush1.bf16.msra.mxu0 %v5033_v4  ;;  %v70_v4 = vld [vmem:[%s7144_s0 + $0x130] sm:$0xff] }
  0x60   :  { %1267 = vmatpush1.bf16.msra.mxu1 %v5054_v5  ;;  %1185 = vmatprep.subr.bf16.mxu0 %v5041_v6  ;;  %v4173_v5 = vcombine.low %v58_v62, %v62_v63  ;;  %v4182_v6 = vcombine.high %v66_v3, %v70_v4 }
  0x61   :  { %1276 = vmatprep.subr.bf16.mxu1 %v5062_v7  ;;  %v4181_v7 = vcombine.low %v66_v3, %v70_v4 }
  0x62   :  { %1076 = vmatmul.mubr.bf16.gmra.mxu0 %v4177_v9  ;;  %v5086_v9 = vld [vmem:[%s7145_s2 + $0x74] ss:$8 sps:$4 sm:$0xff]  }
  0x63   :  { %1159 = vmatmul.mubr.bf16.gmra.mxu1 %v4179_v10  ;;  %1186 = vmatpush2.bf16.msra.mxu0 %v5039_v14  ;;  %v5087_v10 = vld [vmem:[%s7145_s2 + $0x60] ss:$8 sps:$4 sm:$0xff]  }
  0x64   :  { %1277 = vmatpush2.bf16.msra.mxu1 %v5060_v15  ;;  %1187 = vmatprep.subr.bf16.mxu0 %v5047_v16  ;;  %v5093_v14 = vld [vmem:[%s7145_s2 + $0x40] ss:$8 sps:$4 sm:$0xff]   ;;  %v5095_v15 = vld [vmem:[%s7145_s2 + $0x44] ss:$8 sps:$4 sm:$0xff]  }
  0x65   :  { %1278 = vmatprep.subr.bf16.mxu1 %v5068_v17  ;;  %4305 = vmatprep.mubr.msk.bf16.mxu1 %vm987_vm0, %v4152_v18  ;;  %v5098_v16 = vld [vmem:[%s7145_s2 + $0x10c] ss:$8 sps:$4 sm:$0xff]   ;;  %v5096_v17 = vld [vmem:[%s7145_s2 + $0x108] ss:$8 sps:$4 sm:$0xff]  }
  0x66   :  { %1201 = vmatprep.mubr.bf16.mxu0 %v4150_v19  ;;  %v5101_v18 = vld [vmem:[%s7145_s2 + $0x34] ss:$8 sps:$4 sm:$0xff]   ;;  %v5099_v19 = vld [vmem:[%s7145_s2 + $0x30] ss:$8 sps:$4 sm:$0xff]  }
  0x67   :  { %1188 = vmatpush2.bf16.msra.mxu0 %v5045_v20  ;;  %v5104_v20 = vld [vmem:[%s7145_s2 + $0xfc] ss:$8 sps:$4 sm:$0xff]  }
  0x68   :  { %1279 = vmatpush2.bf16.msra.mxu1 %v5066_v21  ;;  %1189 = vmatprep.subr.bf16.mxu0 %v5053_v22  ;;  %v5102_v21 = vld [vmem:[%s7145_s2 + $0xf8] ss:$8 sps:$4 sm:$0xff]   ;;  %v5107_v22 = vld [vmem:[%s7145_s2 + $0x24] ss:$8 sps:$4 sm:$0xff]  }
  0x69   :  { %1280 = vmatprep.subr.bf16.mxu1 %v5074_v23  ;;  %v5105_v23 = vld [vmem:[%s7145_s2 + $0x20] ss:$8 sps:$4 sm:$0xff]  }
  0x6b   :  { %1190 = vmatpush2.bf16.msra.mxu0 %v5051_v24  ;;  %v5110_v24 = vld [vmem:[%s7145_s2 + $0xec] ss:$8 sps:$4 sm:$0xff]  }
  0x6c   :  { %1281 = vmatpush2.bf16.msra.mxu1 %v5072_v25  ;;  %1191 = vmatprep.subr.bf16.mxu0 %v5059_v26  ;;  %v5108_v25 = vld [vmem:[%s7145_s2 + $0xe8] ss:$8 sps:$4 sm:$0xff]   ;;  %v5113_v26 = vld [vmem:[%s7145_s2 + $0x14] ss:$8 sps:$4 sm:$0xff]  }
  0x6d   :  { %1282 = vmatprep.subr.bf16.mxu1 %v5080_v27  ;;  %v5111_v27 = vld [vmem:[%s7145_s2 + $0x10] ss:$8 sps:$4 sm:$0xff]  }
  0x6f   :  { %1192 = vmatpush2.bf16.msra.mxu0 %v5057_v28  ;;  %v5116_v28 = vld [vmem:[%s7145_s2 + $0xdc] ss:$8 sps:$4 sm:$0xff]  }
  0x70   :  { %1283 = vmatpush2.bf16.msra.mxu1 %v5078_v29  ;;  %1193 = vmatprep.subr.bf16.mxu0 %v5065_v30  ;;  %v5114_v29 = vld [vmem:[%s7145_s2 + $0xd8] ss:$8 sps:$4 sm:$0xff]   ;;  %v5119_v30 = vld [vmem:[%s7145_s2 + $0x4] ss:$8 sps:$4 sm:$0xff]  }
  0x71   :  { %1603 = vmatprep.subr.bf16.mxu1 %v5098_v16 }
  0x73   :  { %1285 = vmatmul.mubr.bf16.vlgmr.msra.gmra.mxu1 %v4151_v33  ;;  %1194 = vmatpush2.bf16.msra.mxu0 %v5063_v34  ;;  %v1449_v33 = vld [vmem:[%s7145_s2 + $0x90] sm:$0xff] }
  0x74   :  { %4306 = vmatprep.mubr.msk.bf16.mxu1 %vm987_vm0, %v4160_v35  ;;  %1195 = vmatprep.subr.bf16.mxu0 %v5071_v36  ;;  %v5120_v34 = vld [vmem:[%s7145_s2 + $0xc8] ss:$8 sps:$4 sm:$0xff]   ;;  %v4389_v35 = vcombine.high %v1449_v33, %v1449_v33  ;;  %v4388_v36 = vcombine.low %v1449_v33, %v1449_v33 }
  0x75   :  { %1604 = vmatpush1.bf16.msra.mxu1 %v5096_v17 }
  0x76   :  { %1605 = vmatprep.subr.bf16.mxu1 %v5104_v20 }
  0x77   :  { %1196 = vmatpush2.bf16.msra.mxu0 %v5069_v37  ;;  %v1771_v37 = vsel %vm1415_vm1, %v4388_v36, 0 }
  0x78   :  { %1197 = vmatprep.subr.bf16.mxu0 %v5077_v38  ;;  %v5126_v38 = vld [vmem:[%s7145_s2 + $0xbc] ss:$8 sps:$4 sm:$0xff]  }
  0x79   :  { %1606 = vmatpush1.bf16.msra.mxu1 %v5102_v21 }
  0x7a   :  { %1607 = vmatprep.subr.bf16.mxu1 %v5110_v24 }
  0x7b   :  { %1295 = vmatmul.mubr.bf16.gmra.mxu1 %v4159_v41  ;;  %1198 = vmatpush2.bf16.msra.mxu0 %v5075_v42  ;;  %v5127_v41 = vld [vmem:[%s7145_s2 + $0x80] ss:$8 sps:$4 sm:$0xff]   ;;  %v5132_v42 = vld [vmem:[%s7145_s2 + $0xac] ss:$8 sps:$4 sm:$0xff]  }
  0x7c   :  { %4307 = vmatprep.mubr.msk.bf16.mxu1 %vm987_vm0, %v4168_v43  ;;  %1199 = vmatprep.subr.bf16.mxu0 %v5083_v44  ;;  %v5130_v43 = vld [vmem:[%s7145_s2 + $0xa8] ss:$8 sps:$4 sm:$0xff]   ;;  %v5137_v44 = vld [vmem:[%s7145_s2 + $0x23c] ss:$8 sps:$4 sm:$0xff]  }
  0x7d   :  { %1608 = vmatpush1.bf16.msra.mxu1 %v5108_v25 }
  0x7e   :  { %1609 = vmatprep.subr.bf16.mxu1 %v5116_v28 }
  0x7f   :  { %1200 = vmatpush2.bf16.msra.mxu0 %v5081_v45  ;;  %v5140_v45 = vld [vmem:[%s7145_s2 + $0x9c] ss:$8 sps:$4 sm:$0xff]  }
  0x80   :  { %1776 = vmatprep.subr.bf16.mxu0 %v5086_v9 }
  0x81   :  { %1610 = vmatpush1.bf16.msra.mxu1 %v5114_v29 }
  0x82   :  { %1202 = vmatmul.mubr.bf16.vlgmr.msra.gmra.mxu0 %v4149_v50  ;;  %1611 = vmatprep.subr.bf16.mxu1 %v5122_v32  ;;  %v1598_v50 = vsel %vm1415_vm1, %v4361_v49, 0 }
  0x83   :  { %1305 = vmatmul.mubr.bf16.gmra.mxu1 %v4167_v51  ;;  %1211 = vmatprep.mubr.bf16.mxu0 %v4158_v52  ;;  %v5152_v51 = vld [vmem:[%s7145_s2 + $0x11c] ss:$8 sps:$4 sm:$0xff]   ;;  %v5150_v52 = vld [vmem:[%s7145_s2 + $0x118] ss:$8 sps:$4 sm:$0xff]  }
  0x84   :  { %4308 = vmatprep.mubr.msk.bf16.mxu1 %vm987_vm0, %v4176_v53  ;;  %1777 = vmatpush1.bf16.msra.mxu0 %v5084_v8  ;;  %v5162_v53 = vld [vmem:[%s7145_s2 + $0x1a4] ss:$8 sps:$4 sm:$0xff]  }
  0x85   :  { %1778 = vmatprep.subr.bf16.mxu0 %v5089_v11  ;;  %1612 = vmatpush1.bf16.msra.mxu1 %v5120_v34 }
  0x86   :  { %1613 = vmatprep.subr.bf16.mxu1 %v5126_v38 }
  0x88   :  { %1779 = vmatpush1.bf16.msra.mxu0 %v5087_v10 }
  0x89   :  { %1780 = vmatprep.subr.bf16.mxu0 %v5092_v13  ;;  %1614 = vmatpush1.bf16.msra.mxu1 %v5124_v39 }
  0x8a   :  { %1212 = vmatmul.mubr.bf16.gmra.mxu0 %v4157_v58  ;;  %1615 = vmatprep.subr.bf16.mxu1 %v5132_v42 }
  0x8b   :  { %1315 = vmatmul.mubr.bf16.gmra.mxu1 %v4175_v59  ;;  %1221 = vmatprep.mubr.bf16.mxu0 %v4166_v60 }
  0x8c   :  { %4309 = vmatprep.mubr.msk.bf16.mxu1 %vm987_vm0, %v4184_v61  ;;  %1781 = vmatpush1.bf16.msra.mxu0 %v5090_v12 }
  0x8d   :  { %1782 = vmatprep.subr.bf16.mxu0 %v5095_v15  ;;  %1616 = vmatpush1.bf16.msra.mxu1 %v5130_v43 }
  0x8e   :  { %1617 = vmatprep.subr.bf16.mxu1 %v5140_v45 }
  0x90   :  { %1783 = vmatpush1.bf16.msra.mxu0 %v5093_v14 }
  0x91   :  { %1784 = vmatprep.subr.bf16.mxu0 %v5101_v18  ;;  %1618 = vmatpush1.bf16.msra.mxu1 %v5138_v46 }
  0x92   :  { %1222 = vmatmul.mubr.bf16.gmra.mxu0 %v4165_v0  ;;  %4363 = vmatprep.subr.msk.bf16.mxu1 %vm1415_vm1, %v4362_v48 }
  0x93   :  { %1325 = vmatmul.mubr.bf16.gmra.mxu1 %v4183_v1  ;;  %1231 = vmatprep.mubr.bf16.mxu0 %v4174_v2 }
  0x94   :  { %1785 = vmatpush1.bf16.msra.mxu0 %v5099_v19 }
  0x95   :  { %1786 = vmatprep.subr.bf16.mxu0 %v5107_v22  ;;  %1632 = vmatpush2.bf16.msra.mxu1 %v1598_v50 }
  0x96   :  { %1633 = vmatprep.subr.bf16.mxu1 %v5152_v51 }
  0x98   :  { %1787 = vmatpush1.bf16.msra.mxu0 %v5105_v23 }
  0x99   :  { %1788 = vmatprep.subr.bf16.mxu0 %v5113_v26  ;;  %1634 = vmatpush2.bf16.msra.mxu1 %v5150_v52 }
  0x9a   :  { %1232 = vmatmul.mubr.bf16.gmra.mxu0 %v4173_v5  ;;  %1972 = vmatprep.subr.bf16.mxu1 %v5162_v53 }
  0x9b   :  { %1241 = vmatprep.mubr.bf16.mxu0 %v4182_v6 }
  0x9c   :  { %1789 = vmatpush1.bf16.msra.mxu0 %v5111_v27 }
  0x9d   :  { %1790 = vmatprep.subr.bf16.mxu0 %v5119_v30 }
  0xa0   :  { %1791 = vmatpush1.bf16.msra.mxu0 %v5117_v31 }
  0xa1   :  { %4390 = vmatprep.subr.msk.bf16.mxu0 %vm1415_vm1, %v4389_v35 }
  0xa2   :  { %1242 = vmatmul.mubr.bf16.gmra.mxu0 %v4181_v7 }
  0xa4   :  { %1805 = vmatpush2.bf16.msra.mxu0 %v1771_v37 }
  0xa5   :  { %1806 = vmatprep.subr.bf16.mxu0 %v5129_v40 }
  0xa8   :  { %1807 = vmatpush2.bf16.msra.mxu0 %v5127_v41 }
  0xa9   :  { %2180 = vmatprep.subr.bf16.mxu0 %v5137_v44 }
 0x102   :  { %v1037_v54 = vpop.f32.mrf.mxu0 }
 0x103   :  { %v1120_v55 = vpop.f32.mrf.mxu1 }
 0x104   :  { %v1039_v56 = vpop.f32.mrf.mxu0  ;;  %v1121_v38 = vadd.f32 %v1120_v55, %v1037_v54 }
 0x105   :  { %v1122_v57 = vpop.f32.mrf.mxu1 }
 0x106   :  { %v1041_v58 = vpop.f32.mrf.mxu0  ;;  %v1123_v41 = vadd.f32 %v1122_v57, %v1039_v56  ;;  %v5186_v56 = vld [vmem:[%s7145_s2 + $0x1cc] ss:$8 sps:$4 sm:$0xff]  }
 0x107   :  { %v1124_v59 = vpop.f32.mrf.mxu1 }
 0x108   :  { %v1043_v60 = vpop.f32.mrf.mxu0  ;;  %v1125_v45 = vadd.f32 %v1124_v59, %v1041_v58 }
 0x109   :  { %v1126_v61 = vpop.f32.mrf.mxu1 }
 0x10a   :  { %v1047_v62 = vpop.f32.mrf.mxu0  ;;  %v1127_v50 = vadd.f32 %v1126_v61, %v1043_v60 }
 0x10b   :  { %v1130_v63 = vpop.f32.mrf.mxu1 }
 0x10c   :  { %v6189_v0 = vpop.f32.mrf.mxu0  ;;  %v1131_v53 = vadd.f32 %v1130_v63, %v1047_v62 }
 0x10d   :  { %v1132_v1 = vpop.f32.mrf.mxu1 }
 0x10e   :  { %v6191_v2 = vpop.f32.mrf.mxu0  ;;  %v1133_v59 = vadd.f32 %v1132_v1, %v6189_v0 }
 0x10f   :  { %v6193_v3 = vpop.f32.mrf.mxu1 }
 0x110   :  { %v6195_v4 = vpop.f32.mrf.mxu0  ;;  %v1135_v62 = vadd.f32 %v6193_v3, %v6191_v2 }
 0x111   :  { %v6197_v5 = vpop.f32.mrf.mxu1 }
 0x112   :  { %v6201_v7 = vpop.f32.mrf.mxu0  ;;  %v1137_v0 = vadd.f32 %v6197_v5, %v6195_v4 }
 0x113   :  { %v6199_v6 = vpop.f32.mrf.mxu1 }
 0x114   :  { %v6207_v10 = vpop.f32.mrf.mxu0  ;;  %v1141_v2 = vadd.f32 %v6199_v6, %v6201_v7 }
 0x115   :  { %v6203_v8 = vpop.f32.mrf.mxu1 }
 0x116   :  { %v6213_v13 = vpop.f32.mrf.mxu0 }
 0x117   :  { %v6205_v9 = vpop.f32.mrf.mxu1 }
 0x118   :  { %v6219_v16 = vpop.f32.mrf.mxu0 }
 0x119   :  { %v6209_v11 = vpop.f32.mrf.mxu1 }
 0x11a   :  { %v6223_v18 = vpop.f32.mrf.mxu0 }
 0x11b   :  { %v6211_v12 = vpop.f32.mrf.mxu1 }
 0x11c   :  { %v6227_v20 = vpop.f32.mrf.mxu0 }
 0x11d   :  { %v6215_v14 = vpop.f32.mrf.mxu1 }
 0x11e   :  { %v6231_v22 = vpop.f32.mrf.mxu0 }
 0x11f   :  { %v6217_v15 = vpop.f32.mrf.mxu1 }
 0x120   :  { %v6235_v24 = vpop.f32.mrf.mxu0 }
 0x121   :  { %v6221_v17 = vpop.f32.mrf.mxu1 }
 0x122   :  { %v6239_v27 = vpop.f32.mrf.mxu0 }
 0x123   :  { %v6225_v19 = vpop.f32.mrf.mxu1 }
 0x124   :  { %v6241_v30 = vpop.f32.mrf.mxu0 }
 0x125   :  { %v6229_v21 = vpop.f32.mrf.mxu1 }
 0x126   :  { %v6243_v33 = vpop.f32.mrf.mxu0 }
 0x127   :  { %v6233_v23 = vpop.f32.mrf.mxu1 }
 0x128   :  { %7152 = vst [vmem:[#allocation4_spill] sm:$0xff] %v6233_v23  ;;  %v6245_v36 = vpop.f32.mrf.mxu0 }
 0x129   :  { %v6237_v25 = vpop.f32.mrf.mxu1  ;;  %7154 = vst [vmem:[#allocation6_spill] sm:$0xff] %v6245_v36 }
 0x12a   :  { %7153 = vst [vmem:[#allocation5_spill] sm:$0xff] %v6237_v25 }
 0x133   :  { %v1286_v26 = vpop.f32.mrf.mxu1 }
 0x135   :  { %v1288_v28 = vpop.f32.mrf.mxu1 }
 0x137   :  { %v1290_v29 = vpop.f32.mrf.mxu1 }
 0x139   :  { %v1292_v31 = vpop.f32.mrf.mxu1 }
 0x13b   :  { %v1296_v32 = vpop.f32.mrf.mxu1 }
 0x13d   :  { %v1298_v34 = vpop.f32.mrf.mxu1 }
 0x13f   :  { %v1300_v35 = vpop.f32.mrf.mxu1 }
 0x141   :  { %v1302_v37 = vpop.f32.mrf.mxu1 }
 0x142   :  { %v1203_v39 = vpop.f32.mrf.mxu0 }
 0x143   :  { %v1306_v40 = vpop.f32.mrf.mxu1  ;;  %v1204_v42 = vadd.f32 %v1203_v39, %v1121_v38 }
 0x144   :  { %v1205_v43 = vpop.f32.mrf.mxu0 }
 0x145   :  { %v1308_v44 = vpop.f32.mrf.mxu1  ;;  %v1287_v46 = vadd.f32 %v1286_v26, %v1204_v42  ;;  %v1206_v47 = vadd.f32 %v1205_v43, %v1123_v41 }
 0x146   :  { %v1207_v48 = vpop.f32.mrf.mxu0 }
 0x147   :  { %v6247_v49 = vpop.f32.mrf.mxu1  ;;  %v1289_v51 = vadd.f32 %v1288_v28, %v1206_v47  ;;  %v1208_v52 = vadd.f32 %v1207_v48, %v1125_v45  ;;  %v1335_v36 = vmax.f32 %v1287_v46, 0.0  ;;  %v1143_v47 = vadd.f32 %v6203_v8, %v6207_v10 }
 0x148   :  { %v1209_v25 = vpop.f32.mrf.mxu0  ;;  %v1145_v48 = vadd.f32 %v6205_v9, %v6213_v13 }
 0x149   :  { %v1336_v54 = vmax.f32 %v1289_v51, 0.0  ;;  %v1291_v55 = vadd.f32 %v1290_v29, %v1208_v52  ;;  %v1210_v23 = vadd.f32 %v1209_v25, %v1127_v50  ;;  %v1312_v58 = vpop.f32.mrf.mxu1 }
 0x14a   :  { %v1213_v57 = vpop.f32.mrf.mxu0 }
 0x14b   :  { %v4894_v26 = vpack.c.bf16 %v1336_v54, %v1335_v36  ;;  %v1293_v60 = vadd.f32 %v1292_v31, %v1210_v23  ;;  %v1214_v61 = vadd.f32 %v1213_v57, %v1131_v53  ;;  %v6257_v28 = vpop.f32.mrf.mxu1  ;;  %v1337_v25 = vmax.f32 %v1291_v55, 0.0 }
 0x14c   :  { %v1215_v63 = vpop.f32.mrf.mxu0  ;;  %v1147_v54 = vadd.f32 %v6209_v11, %v6219_v16  ;;  %v1151_v55 = vadd.f32 %v6211_v12, %v6223_v18  ;;  %v5135_v12 = vld [vmem:[%s7145_s2 + $0x238] ss:$8 sps:$4 sm:$0xff]   ;;  %v1153_v18 = vadd.f32 %v6215_v14, %v6227_v20 }
 0x14d   :  { %1418 = vst.msk [vmem:[#allocation2] sm:$0xff] %vm6250_vm3, %v4894_v26  ;;  %v1338_v29 = vmax.f32 %v1293_v60, 0.0  ;;  %v1297_v38 = vadd.f32 %v1296_v32, %v1214_v61  ;;  %v1216_v39 = vadd.f32 %v1215_v63, %v1133_v59  ;;  %v1318_v36 = vpop.f32.mrf.mxu1 }
 0x14e   :  { %v1217_v41 = vpop.f32.mrf.mxu0 }
 0x14f   :  { %v4895_v1 = vpack.c.bf16 %v1338_v29, %v1337_v25  ;;  %v1299_v23 = vadd.f32 %v1298_v34, %v1216_v39  ;;  %v1218_v31 = vadd.f32 %v1217_v41, %v1135_v62  ;;  %v1339_v42 = vmax.f32 %v1297_v38, 0.0  ;;  %v1320_v7 = vpop.f32.mrf.mxu1 }
 0x150   :  { %v1219_v3 = vpop.f32.mrf.mxu0  ;;  %v1155_v29 = vadd.f32 %v6217_v15, %v6231_v22  ;;  %v5142_v22 = vld [vmem:[%s7145_s2 + $0x228] ss:$8 sps:$4 sm:$0xff]  }
 0x151   :  { %1419 = vst.msk [vmem:[#allocation2 + $0x8] sm:$0xff] %vm6250_vm3, %v4895_v1  ;;  %v1340_v43 = vmax.f32 %v1299_v23, 0.0  ;;  %v1301_v45 = vadd.f32 %v1300_v35, %v1218_v31  ;;  %v1220_v32 = vadd.f32 %v1219_v3, %v1137_v0  ;;  %v1322_v26 = vpop.f32.mrf.mxu1  ;;  %v1157_v23 = vadd.f32 %v6221_v17, %v6235_v24 }
 0x152   :  { %v1223_v46 = vpop.f32.mrf.mxu0 }
 0x153   :  { %v4896_v4 = vpack.c.bf16 %v1340_v43, %v1339_v42  ;;  %v1303_v5 = vadd.f32 %v1302_v37, %v1220_v32  ;;  %v1224_v34 = vadd.f32 %v1223_v46, %v1141_v2  ;;  %v1341_v50 = vmax.f32 %v1301_v45, 0.0  ;;  %v1326_v0 = vpop.f32.mrf.mxu1 }
 0x154   :  { %v1225_v6 = vpop.f32.mrf.mxu0  ;;  %v1428_v57 = vld [vmem:[#allocation2] sm:$0xff]  ;;  %v1161_v42 = vadd.f32 %v6225_v19, %v6239_v27 }
 0x155   :  { %1420 = vst.msk [vmem:[#allocation2 + $0x10] sm:$0xff] %vm6250_vm3, %v4896_v4  ;;  %v1342_v51 = vmax.f32 %v1303_v5, 0.0  ;;  %v1307_v52 = vadd.f32 %v1306_v40, %v1224_v34  ;;  %v1226_v35 = vadd.f32 %v1225_v6, %v1143_v47  ;;  %v1328_v24 = vpop.f32.mrf.mxu1  ;;  %v1163_v47 = vadd.f32 %v6229_v21, %v6241_v30  ;;  %v5147_v19 = vld [vmem:[%s7145_s2 + $0x218] ss:$8 sps:$4 sm:$0xff]   ;;  %v5155_v6 = vld [vmem:[%s7145_s2 + $0x20c] ss:$8 sps:$4 sm:$0xff]  }
 0x156   :  { %v1227_v53 = vpop.f32.mrf.mxu0 }
 0x157   :  { %v4897_v8 = vpack.c.bf16 %v1342_v51, %v1341_v50  ;;  %v1309_v10 = vadd.f32 %v1308_v44, %v1226_v35  ;;  %v1228_v37 = vadd.f32 %v1227_v53, %v1145_v48  ;;  %v1343_v9 = vmax.f32 %v1307_v52, 0.0  ;;  %v7157_v50 = vld [vmem:[#allocation4_spill] sm:$0xff]  ;;  %v1330_v52 = vpop.f32.mrf.mxu1 }
 0x158   :  { %v1229_v13 = vpop.f32.mrf.mxu0  ;;  %v6277_v59 = vld [vmem:[#allocation2 + $0x8] sm:$0xff]  ;;  %v1165_v51 = vadd.f32 %v7157_v50, %v6243_v33  ;;  %v5194_v50 = vld [vmem:[%s7145_s2 + $0x154] ss:$8 sps:$4 sm:$0xff]  }
 0x159   :  { %1421 = vst.msk [vmem:[#allocation2 + $0x18] sm:$0xff] %vm6250_vm3, %v4897_v8  ;;  %v1344_v40 = vmax.f32 %v1309_v10, 0.0  ;;  %v1311_v60 = vadd.f32 %v6247_v49, %v1228_v37  ;;  %v1230_v11 = vadd.f32 %v1229_v13, %v1147_v54  ;;  %v4366_v16 = vcombine.low %v1428_v57, %v6277_v59  ;;  %v5144_v49 = vld [vmem:[%s7145_s2 + $0x22c] ss:$8 sps:$4 sm:$0xff]   ;;  %v5153_v33 = vld [vmem:[%s7145_s2 + $0x208] ss:$8 sps:$4 sm:$0xff]  }
 0x15a   :  { %v1233_v44 = vpop.f32.mrf.mxu0  ;;  %v4367_v61 = vcombine.high %v1428_v57, %v6277_v59  ;;  %v7158_v57 = vld [vmem:[#allocation6_spill] sm:$0xff] }
 0x15b   :  { %v4898_v62 = vpack.c.bf16 %v1344_v40, %v1343_v9  ;;  %v1313_v63 = vadd.f32 %v1312_v58, %v1230_v11  ;;  %v1234_v25 = vadd.f32 %v1233_v44, %v1151_v55  ;;  %v1345_v38 = vmax.f32 %v1311_v60, 0.0  ;;  %v5165_v44 = vld [vmem:[%s7145_s2 + $0x1fc] ss:$8 sps:$4 sm:$0xff]  }
 0x15c   :  { %4391 = vmatprep.mubr.msk.bf16.mxu0 %vm1590_vm4, %v4367_v61  ;;  %v1235_v39 = vpop.f32.mrf.mxu0  ;;  %v1430_v41 = vld [vmem:[#allocation2 + $0x10] sm:$0x11] }
 0x15d   :  { %1422 = vst.msk [vmem:[#allocation2 + $0x20] sm:$0xff] %vm6250_vm3, %v4898_v62  ;;  %v1346_v14 = vmax.f32 %v1313_v63, 0.0  ;;  %v1236_v20 = vadd.f32 %v1235_v39, %v1153_v18  ;;  %v1317_v58 = vadd.f32 %v6257_v28, %v1234_v25  ;;  %1809 = vmatmul.mubr.bf16.vlgmr.msra.gmra.mxu0 %v4366_v16  ;;  %v4369_v1 = vcombine.high %v1430_v41, %v1430_v41  ;;  %v5149_v28 = vld [vmem:[%s7145_s2 + $0x21c] ss:$8 sps:$4 sm:$0xff]  }
 0x15e   :  { %2181 = vmatpush1.bf16.msra.mxu0 %v5135_v12  ;;  %v1237_v15 = vpop.f32.mrf.mxu0  ;;  %v4368_v48 = vcombine.low %v1430_v41, %v1430_v41  ;;  %v1332_v12 = vpop.f32.mrf.mxu1  ;;  %v5160_v41 = vld [vmem:[%s7145_s2 + $0x1a0] ss:$8 sps:$4 sm:$0xff]  }
 0x15f   :  { %v4899_v31 = vpack.c.bf16 %v1346_v14, %v1345_v38  ;;  %v1238_v2 = vadd.f32 %v1237_v15, %v1155_v29  ;;  %v1319_v3 = vadd.f32 %v1318_v36, %v1236_v20  ;;  %4392 = vmatprep.mubr.msk.bf16.mxu0 %vm1590_vm4, %v4369_v1  ;;  %2182 = vmatprep.subr.bf16.mxu0 %v5144_v49  ;;  %v1347_v43 = vmax.f32 %v1317_v58, 0.0  ;;  %v5163_v20 = vld [vmem:[%s7145_s2 + $0x1f8] ss:$8 sps:$4 sm:$0xff]   ;;  %v5168_v58 = vld [vmem:[%s7145_s2 + $0x194] ss:$8 sps:$4 sm:$0xff]  }
 0x160   :  { %v1239_v17 = vpop.f32.mrf.mxu0  ;;  %v6311_v36 = vld [vmem:[#allocation2 + $0x18] sm:$0xff]  ;;  %v5171_v15 = vld [vmem:[%s7145_s2 + $0x1ec] ss:$8 sps:$4 sm:$0xff]  }
 0x161   :  { %1423 = vst.msk [vmem:[#allocation2 + $0x28] sm:$0xff] %vm6250_vm3, %v4899_v31  ;;  %v1348_v45 = vmax.f32 %v1319_v3, 0.0  ;;  %v1240_v32 = vadd.f32 %v1239_v17, %v1157_v23  ;;  %v1321_v46 = vadd.f32 %v1320_v7, %v1238_v2  ;;  %v1450_v7 = vld [vmem:[#allocation2 + $0x10] sm:$0xcc]  ;;  %v5177_v17 = vld [vmem:[%s7145_s2 + $0x1dc] ss:$8 sps:$4 sm:$0xff]  }
 0x162   :  { %2183 = vmatpush1.bf16.msra.mxu0 %v5142_v22  ;;  %v1243_v4 = vpop.f32.mrf.mxu0  ;;  %v4339_v53 = vcombine.low %v1450_v7, %v6311_v36  ;;  %v4340_v54 = vcombine.high %v1450_v7, %v6311_v36  ;;  %v5166_v2 = vld [vmem:[%s7145_s2 + $0x190] ss:$8 sps:$4 sm:$0xff]  }
 0x163   :  { %v4900_v27 = vpack.c.bf16 %v1348_v45, %v1347_v43  ;;  %v1244_v5 = vadd.f32 %v1243_v4, %v1161_v42  ;;  %v1323_v34 = vadd.f32 %v1322_v26, %v1240_v32  ;;  %2184 = vmatprep.subr.bf16.mxu0 %v5149_v28  ;;  %v1349_v21 = vmax.f32 %v1321_v46, 0.0  ;;  %v7159_v26 = vld [vmem:[#allocation5_spill] sm:$0xff]  ;;  %v5169_v3 = vld [vmem:[%s7145_s2 + $0x1e8] ss:$8 sps:$4 sm:$0xff]   ;;  %v5174_v28 = vld [vmem:[%s7145_s2 + $0x184] ss:$8 sps:$4 sm:$0xff]  }
 0x164   :  { %v1245_v30 = vpop.f32.mrf.mxu0  ;;  %v1452_v35 = vld [vmem:[#allocation2 + $0x20] sm:$0x77]  ;;  %v1167_v40 = vadd.f32 %v7159_v26, %v7158_v57  ;;  %v1490_v18 = vrot.slane %v4340_v54, 2  ;;  %v1487_v63 = vrot.slane %v4339_v53, 2  ;;  %v5183_v45 = vld [vmem:[%s7145_s2 + $0x174] ss:$8 sps:$4 sm:$0xff]  }
 0x165   :  { %1424 = vst.msk [vmem:[#allocation2 + $0x30] sm:$0xff] %vm6250_vm3, %v4900_v27  ;;  %v1350_v8 = vmax.f32 %v1323_v34, 0.0  ;;  %v1246_v10 = vadd.f32 %v1245_v30, %v1163_v47  ;;  %v1327_v37 = vadd.f32 %v1326_v0, %v1244_v5  ;;  %1819 = vmatmul.mubr.bf16.gmra.mxu0 %v4368_v48  ;;  %v4341_v55 = vcombine.low %v1452_v35, %v1452_v35  ;;  %v5175_v43 = vld [vmem:[%s7145_s2 + $0x1d8] ss:$8 sps:$4 sm:$0xff]   ;;  %v5184_v4 = vld [vmem:[%s7145_s2 + $0x1c8] ss:$8 sps:$4 sm:$0xff]  }
 0x166   :  { %2185 = vmatpush1.bf16.msra.mxu0 %v5147_v19  ;;  %v1247_v9 = vpop.f32.mrf.mxu0  ;;  %v4342_v13 = vcombine.high %v1452_v35, %v1452_v35  ;;  %v4457_v46 = vld [vmem:[%s7145_s2 + $0x258] sm:$0xff]  ;;  %v5189_v19 = vld [vmem:[%s7145_s2 + $0x164] ss:$8 sps:$4 sm:$0xff]   ;;  %v5206_v57 = vld [vmem:[%s7145_s2 + $0x368] ss:$8 sps:$4 sm:$0xff]  }
 0x167   :  { %v4901_v60 = vpack.c.bf16 %v1350_v8, %v1349_v21  ;;  %v1248_v11 = vadd.f32 %v1247_v9, %v1165_v51  ;;  %v1329_v16 = vadd.f32 %v1328_v24, %v1246_v10  ;;  %2186 = vmatprep.subr.bf16.mxu0 %v5155_v6  ;;  %v1488_v25 = vrot.slane %v4341_v55, 2  ;;  %v5172_v24 = vld [vmem:[%s7145_s2 + $0x180] ss:$8 sps:$4 sm:$0xff]   ;;  %v5181_v47 = vld [vmem:[%s7145_s2 + $0x170] ss:$8 sps:$4 sm:$0xff]  }
 0x168   :  { %v1249_v61 = vpop.f32.mrf.mxu0  ;;  %v1491_v62 = vrot.slane %v4342_v13, 2  ;;  %v1351_v49 = vmax.f32 %v1327_v37, 0.0  ;;  %v4481_v27 = vcombine.high %v4457_v46, %v4457_v46  ;;  %v4480_v5 = vcombine.low %v4457_v46, %v4457_v46  ;;  %v5187_v6 = vld [vmem:[%s7145_s2 + $0x160] ss:$8 sps:$4 sm:$0xff]   ;;  %v5192_v53 = vld [vmem:[%s7145_s2 + $0x150] ss:$8 sps:$4 sm:$0xff]  }
 0x169   :  { %1425 = vst.msk [vmem:[#allocation2 + $0x38] sm:$0xff] %vm6250_vm3, %v4901_v60  ;;  %v1352_v29 = vmax.f32 %v1329_v16, 0.0  ;;  %v1250_v38 = vadd.f32 %v1249_v61, %v1167_v40  ;;  %v1331_v39 = vadd.f32 %v1330_v52, %v1248_v11  ;;  %v1489_v14 = vsel %vm1486_vm5, %v1487_v63, %v1488_v25  ;;  %v5202_v52 = vld [vmem:[%s7145_s2 + $0x24c] ss:$8 sps:$4 sm:$0xff]   ;;  %v5200_v8 = vld [vmem:[%s7145_s2 + $0x248] ss:$8 sps:$4 sm:$0xff]  }
 0x16a   :  { %2187 = vmatpush1.bf16.msra.mxu0 %v5153_v33  ;;  %v1492_v0 = vsel %vm1486_vm5, %v1490_v18, %v1491_v62  ;;  %v2175_v51 = vsel %vm1415_vm1, %v4480_v5, 0  ;;  %v5205_v37 = vld [vmem:[%s7145_s2 + $0x144] ss:$8 sps:$4 sm:$0xff]   ;;  %v5203_v33 = vld [vmem:[%s7145_s2 + $0x140] ss:$8 sps:$4 sm:$0xff]  }
 0x16b   :  { %v4902_v1 = vpack.c.bf16 %v1352_v29, %v1351_v49  ;;  %v1333_v23 = vadd.f32 %v1332_v12, %v1250_v38  ;;  %4364 = vmatprep.mubr.msk.bf16.mxu1 %vm1590_vm4, %v1492_v0  ;;  %2188 = vmatprep.subr.bf16.mxu0 %v5165_v44  ;;  %v1353_v22 = vmax.f32 %v1331_v39, 0.0  ;;  %v5208_v55 = vld [vmem:[%s7145_s2 + $0x36c] ss:$8 sps:$4 sm:$0xff]   ;;  %v6425_v26 = vld [vmem:[#allocation2 + $0x20] sm:$0xff]  ;;  %v5209_v44 = vld [vmem:[%s7145_s2 + $0x130] ss:$8 sps:$4 sm:$0xff]  }
 0x16c   :  { %1636 = vmatmul.mubr.bf16.vlgmr.msra.gmra.mxu1 %v1489_v14  ;;  %v5180_v32 = vld [vmem:[#allocation2 + $0x2c] ss:$8 sps:$4 sm:$0xff]   ;;  %v5214_v60 = vld [vmem:[%s7145_s2 + $0x35c] ss:$8 sps:$4 sm:$0xff]   ;;  %v4553_v61 = vcombine.high %v6425_v26, %v6425_v26  ;;  %v5212_v12 = vld [vmem:[%s7145_s2 + $0x358] ss:$8 sps:$4 sm:$0xff]  }
 0x16d   :  { %1426 = vst.msk [vmem:[#allocation2 + $0x40] sm:$0xff] %vm6250_vm3, %v4902_v1  ;;  %v1354_v31 = vmax.f32 %v1333_v23, 0.0  ;;  %1973 = vmatpush1.bf16.msra.mxu1 %v5160_v41  ;;  %4365 = vmatprep.mubr.msk.bf16.mxu1 %vm1590_vm4, %v1491_v62  ;;  %v5211_v40 = vld [vmem:[%s7145_s2 + $0x134] ss:$8 sps:$4 sm:$0xff]   ;;  %v4411_v11 = vld [vmem:[%s7145_s2 + $0x1c0] sm:$0xff] }
 0x16e   :  { %2189 = vmatpush1.bf16.msra.mxu0 %v5163_v20  ;;  %1974 = vmatprep.subr.bf16.mxu1 %v5168_v58  ;;  %v4435_v18 = vcombine.high %v4411_v11, %v4411_v11  ;;  %v4434_v62 = vcombine.low %v4411_v11, %v4411_v11  ;;  %v6446_v63 = vld [vmem:[#allocation2 + $0x10] sm:$0x88]  ;;  %v6453_v29 = vrot.slane %v4553_v61, 3  ;;  %v5229_v14 = vld [vmem:[%s7145_s2 + $0x33c] ss:$8 sps:$4 sm:$0xff]  }
 0x16f   :  { %v4903_v42 = vpack.c.bf16 %v1354_v31, %v1353_v22  ;;  %2190 = vmatprep.subr.bf16.mxu0 %v5171_v15  ;;  %v4551_v49 = vcombine.high %v6446_v63, %v6311_v36  ;;  %v5217_v39 = vld [vmem:[%s7145_s2 + $0x348] ss:$8 sps:$4 sm:$0xff]   ;;  %v5226_v0 = vld [vmem:[%s7145_s2 + $0x1b4] ss:$8 sps:$4 sm:$0xff]   ;;  %v5227_v1 = vld [vmem:[%s7145_s2 + $0x338] ss:$8 sps:$4 sm:$0xff]  }
 0x170   :  { %v1967_v38 = vsel %vm1415_vm1, %v4434_v62, 0  ;;  %v5224_v58 = vld [vmem:[%s7145_s2 + $0x1b0] ss:$8 sps:$4 sm:$0xff]   ;;  %v5232_v23 = vld [vmem:[%s7145_s2 + $0x2d4] ss:$8 sps:$4 sm:$0xff]  }
 0x171   :  { %1427 = vst.msk [vmem:[#allocation2 + $0x48] sm:$0xff] %vm6250_vm3, %v4903_v42  ;;  %1975 = vmatpush1.bf16.msra.mxu1 %v5166_v2  ;;  %v2478_v41 = vrot.slane %v4551_v49, 3  ;;  %v5236_v15 = vld [vmem:[%s7145_s2 + $0x32c] ss:$8 sps:$4 sm:$0xff]   ;;  %v1829_v22 = vld [vmem:[#allocation2 + $0x38] sm:$0x11] }
 0x172   :  { %2191 = vmatpush1.bf16.msra.mxu0 %v5169_v3  ;;  %1976 = vmatprep.subr.bf16.mxu1 %v5174_v28  ;;  %v5230_v31 = vld [vmem:[%s7145_s2 + $0x2d0] ss:$8 sps:$4 sm:$0xff]   ;;  %v5239_v42 = vld [vmem:[%s7145_s2 + $0x2c4] ss:$8 sps:$4 sm:$0xff]   ;;  %v5246_v46 = vld [vmem:[%s7145_s2 + $0x2b4] ss:$8 sps:$4 sm:$0xff]   ;;  %v4414_v5 = vcombine.low %v1829_v22, %v1829_v22 }
 0x173   :  { %2192 = vmatprep.subr.bf16.mxu0 %v5177_v17  ;;  %v2480_v20 = vsel %vm2474_vm6, %v2478_v41, %v6453_v29  ;;  %v6484_v2 = vld [vmem:[#allocation2 + $0x10] sm:$0x33]  ;;  %v4415_v17 = vcombine.high %v1829_v22, %v1829_v22  ;;  %v5279_v62 = vld [vmem:[%s7145_s2 + $0x2e4] ss:$8 sps:$4 sm:$0xff]   ;;  %v5277_v49 = vld [vmem:[%s7145_s2 + $0x2e0] ss:$8 sps:$4 sm:$0xff]  }
 0x174   :  { %1646 = vmatmul.mubr.bf16.gmra.mxu1 %v1488_v25  ;;  %v5197_v34 = vld [vmem:[#allocation2 + $0x3c] ss:$8 sps:$4 sm:$0xfc]   ;;  %v5195_v10 = vld [vmem:[#allocation2 + $0x38] ss:$8 sps:$4 sm:$0xfc]  }
 0x175   :  { %1977 = vmatpush1.bf16.msra.mxu1 %v5172_v24  ;;  %4437 = vmatprep.mubr.msk.bf16.mxu1 %vm1590_vm4, %v5180_v32  ;;  %v2068_v21 = vrot.slane %v5197_v34, 2  ;;  %v2065_v13 = vrot.slane %v5195_v10, 2  ;;  %v5219_v25 = vld [vmem:[%s7145_s2 + $0x34c] ss:$8 sps:$4 sm:$0xff]   ;;  %v5178_v3 = vld [vmem:[#allocation2 + $0x28] ss:$8 sps:$4 sm:$0xff]  }
 0x176   :  { %2193 = vmatpush1.bf16.msra.mxu0 %v5175_v43  ;;  %1978 = vmatprep.subr.bf16.mxu1 %v5183_v45  ;;  %v5234_v28 = vld [vmem:[%s7145_s2 + $0x328] ss:$8 sps:$4 sm:$0xff]   ;;  %v5242_v24 = vld [vmem:[%s7145_s2 + $0x31c] ss:$8 sps:$4 sm:$0xff]   ;;  %v4507_v43 = vcombine.high %v6484_v2, %v6484_v2 }
 0x177   :  { %2194 = vmatprep.subr.bf16.mxu0 %v5186_v56  ;;  %v5237_v45 = vld [vmem:[%s7145_s2 + $0x2c0] ss:$8 sps:$4 sm:$0xff]   ;;  %v4503_v11 = vld [vmem:[%s7145_s2 + $0x2f0] sm:$0xff] }
 0x178   :  { %v2031_v48 = vld [vmem:[#allocation2 + $0x48] sm:$0x77]  ;;  %v6501_v32 = vld [vmem:[#allocation2] sm:$0xee]  ;;  %v4527_v61 = vcombine.high %v4503_v11, %v4503_v11  ;;  %v5282_v41 = vld [vmem:[%s7146_s4 + $0x74] ss:$8 sps:$4 sm:$0xff]  }
 0x179   :  { %1979 = vmatpush1.bf16.msra.mxu1 %v5181_v47  ;;  %v4461_v7 = vcombine.high %v2031_v48, %v2031_v48  ;;  %v4460_v35 = vcombine.low %v2031_v48, %v2031_v48  ;;  %v5240_v56 = vld [vmem:[%s7145_s2 + $0x318] ss:$8 sps:$4 sm:$0xff]   ;;  %v4505_v47 = vcombine.high %v6501_v32, %v6277_v59  ;;  %v5249_v48 = vld [vmem:[%s7145_s2 + $0x308] ss:$8 sps:$4 sm:$0xff]   ;;  %v5294_v22 = vld [vmem:[%s7146_s4 + $0x54] ss:$8 sps:$4 sm:$0xff]  }
 0x17a   :  { %2195 = vmatpush1.bf16.msra.mxu0 %v5184_v4  ;;  %1980 = vmatprep.subr.bf16.mxu1 %v5189_v19  ;;  %v5251_v4 = vld [vmem:[%s7145_s2 + $0x30c] ss:$8 sps:$4 sm:$0xff]   ;;  %v6514_v19 = vrot.slane %v4507_v43, 1 }
 0x17b   :  { %4482 = vmatprep.subr.msk.bf16.mxu0 %vm1415_vm1, %v4481_v27  ;;  %v2069_v30 = vrot.slane %v4461_v7, 2  ;;  %v2066_v9 = vrot.slane %v4460_v35, 2  ;;  %v5244_v27 = vld [vmem:[%s7145_s2 + $0x2b0] ss:$8 sps:$4 sm:$0xff]   ;;  %v2273_v34 = vrot.slane %v4505_v47, 1 }
 0x17c   :  { %v5257_v7 = vld [vmem:[%s7145_s2 + $0x2fc] ss:$8 sps:$4 sm:$0xff]  }
 0x17d   :  { %1981 = vmatpush1.bf16.msra.mxu1 %v5187_v6  ;;  %v2070_v54 = vsel %vm1486_vm5, %v2068_v21, %v2069_v30  ;;  %v2067_v16 = vsel %vm1486_vm5, %v2065_v13, %v2066_v9  ;;  %v5254_v6 = vld [vmem:[%s7145_s2 + $0x2a4] ss:$8 sps:$4 sm:$0xff]   ;;  %v5252_v21 = vld [vmem:[%s7145_s2 + $0x2a0] ss:$8 sps:$4 sm:$0xff]   ;;  %v5306_v43 = vld [vmem:[%s7146_s4 + $0x34] ss:$8 sps:$4 sm:$0xff]  }
 0x17e   :  { %2209 = vmatpush2.bf16.msra.mxu0 %v2175_v51  ;;  %1982 = vmatprep.subr.bf16.mxu1 %v5194_v50  ;;  %v2275_v50 = vsel %vm2269_vm7, %v2273_v34, %v6514_v19  ;;  %v4549_v51 = vld [vmem:[%s7145_s2 + $0x388] sm:$0xff]  ;;  %v5266_v13 = vld [vmem:[%s7145_s2 + $0x378] ss:$8 sps:$4 sm:$0xff]   ;;  %v5315_v47 = vld [vmem:[%s7146_s4 + $0xb4] ss:$8 sps:$4 sm:$0xff]  }
 0x17f   :  { %4483 = vmatprep.mubr.msk.bf16.mxu0 %vm1590_vm4, %v2070_v54  ;;  %2210 = vmatprep.subr.bf16.mxu0 %v5202_v52  ;;  %v5260_v52 = vld [vmem:[%s7145_s2 + $0x294] ss:$8 sps:$4 sm:$0xff]   ;;  %v4573_v35 = vcombine.high %v4549_v51, %v4549_v51  ;;  %v5258_v54 = vld [vmem:[%s7145_s2 + $0x290] ss:$8 sps:$4 sm:$0xff]   ;;  %v5319_v34 = vld [vmem:[%s7146_s4 + $0xa0] ss:$8 sps:$4 sm:$0xff]  }
 0x181   :  { %1983 = vmatpush1.bf16.msra.mxu1 %v5192_v53  ;;  %v4572_v53 = vcombine.low %v4549_v51, %v4549_v51  ;;  %v5330_v51 = vld [vmem:[%s7146_s4 + $0x84] ss:$8 sps:$4 sm:$0xff]  }
 0x182   :  { %2211 = vmatpush2.bf16.msra.mxu0 %v5200_v8  ;;  %1984 = vmatprep.subr.bf16.mxu1 %v5205_v37  ;;  %v5265_v8 = vld [vmem:[%s7145_s2 + $0x284] ss:$8 sps:$4 sm:$0xff]  }
 0x183   :  { %2590 = vmatprep.subr.bf16.mxu0 %v5208_v55  ;;  %v2585_v10 = vsel %vm1415_vm1, %v4572_v53, 0  ;;  %v5268_v37 = vld [vmem:[%s7145_s2 + $0x37c] ss:$8 sps:$4 sm:$0xff]   ;;  %v4552_v55 = vcombine.low %v6425_v26, %v6425_v26 }
 0x184   :  { %v5339_v53 = vld [vmem:[%s7146_s4 + $0x194] ss:$8 sps:$4 sm:$0xff]  }
 0x185   :  { %1985 = vmatpush1.bf16.msra.mxu1 %v5203_v33  ;;  %2213 = vmatmul.mubr.bf16.vlgmr.msra.gmra.mxu0 %v2067_v16  ;;  %v4550_v33 = vcombine.low %v6446_v63, %v6311_v36  ;;  %v2476_v26 = vrot.slane %v4552_v55, 3  ;;  %v4506_v63 = vcombine.low %v6484_v2, %v6484_v2  ;;  %v5297_v2 = vld [vmem:[%s7146_s4 + $0xe4] ss:$8 sps:$4 sm:$0xff]  }
 0x186   :  { %4484 = vmatprep.mubr.msk.bf16.mxu0 %vm1590_vm4, %v2069_v30  ;;  %2591 = vmatpush1.bf16.msra.mxu0 %v5206_v57  ;;  %v5255_v30 = vld [vmem:[%s7145_s2 + $0x2f8] ss:$8 sps:$4 sm:$0xff]   ;;  %v5271_v57 = vld [vmem:[%s7145_s2 + $0x274] ss:$8 sps:$4 sm:$0xff]  }
 0x187   :  { %1986 = vmatprep.subr.bf16.mxu1 %v5211_v40  ;;  %2592 = vmatprep.subr.bf16.mxu0 %v5214_v60  ;;  %v5269_v40 = vld [vmem:[%s7145_s2 + $0x270] ss:$8 sps:$4 sm:$0xff]   ;;  %v2475_v36 = vrot.slane %v4550_v33, 3  ;;  %v5274_v60 = vld [vmem:[%s7145_s2 + $0x264] ss:$8 sps:$4 sm:$0xff]  }
 0x189   :  { %1987 = vmatpush1.bf16.msra.mxu1 %v5209_v44  ;;  %v2477_v16 = vsel %vm2474_vm6, %v2475_v36, %v2476_v26  ;;  %v5272_v44 = vld [vmem:[%s7145_s2 + $0x260] ss:$8 sps:$4 sm:$0xff]  }
 0x18a   :  { %2593 = vmatpush1.bf16.msra.mxu0 %v5212_v12  ;;  %4436 = vmatprep.subr.msk.bf16.mxu1 %vm1415_vm1, %v4435_v18  ;;  %v4526_v12 = vcombine.low %v4503_v11, %v4503_v11 }
 0x18b   :  { %2594 = vmatprep.subr.bf16.mxu0 %v5219_v25  ;;  %v4504_v25 = vcombine.low %v6501_v32, %v6277_v59  ;;  %v5280_v59 = vld [vmem:[%s7146_s4 + $0x70] ss:$8 sps:$4 sm:$0xff]   ;;  %v5309_v32 = vld [vmem:[%s7146_s4 + $0xc4] ss:$8 sps:$4 sm:$0xff]  }
 0x18c   :  { %v2380_v18 = vsel %vm1415_vm1, %v4526_v12, 0 }
 0x18d   :  { %2001 = vmatpush2.bf16.msra.mxu1 %v1967_v38  ;;  %2223 = vmatmul.mubr.bf16.gmra.mxu0 %v2066_v9  ;;  %v5263_v9 = vld [vmem:[%s7145_s2 + $0x280] ss:$8 sps:$4 sm:$0xff]   ;;  %v2270_v38 = vrot.slane %v4504_v25, 1 }
 0x18e   :  { %2595 = vmatpush1.bf16.msra.mxu0 %v5217_v39  ;;  %4575 = vmatprep.mubr.msk.bf16.mxu0 %vm1590_vm4, %v2480_v20  ;;  %v5286_v20 = vld [vmem:[%s7146_s4 + $0x60] ss:$8 sps:$4 sm:$0xff]  }
 0x18f   :  { %2002 = vmatprep.subr.bf16.mxu1 %v5226_v0  ;;  %2596 = vmatprep.subr.bf16.mxu0 %v5229_v14  ;;  %v5283_v0 = vld [vmem:[%s7146_s4 + $0x100] ss:$8 sps:$4 sm:$0xff]   ;;  %v5285_v14 = vld [vmem:[%s7146_s4 + $0x104] ss:$8 sps:$4 sm:$0xff]  }
 0x191   :  { %2003 = vmatpush2.bf16.msra.mxu1 %v5224_v58  ;;  %v5288_v58 = vld [vmem:[%s7146_s4 + $0x64] ss:$8 sps:$4 sm:$0xff]  }
 0x192   :  { %2597 = vmatpush1.bf16.msra.mxu0 %v5227_v1  ;;  %2385 = vmatprep.subr.bf16.mxu1 %v5232_v23  ;;  %v5289_v1 = vld [vmem:[%s7146_s4 + $0xf0] ss:$8 sps:$4 sm:$0xff]   ;;  %v5291_v23 = vld [vmem:[%s7146_s4 + $0xf4] ss:$8 sps:$4 sm:$0xff]  }
 0x193   :  { %2598 = vmatprep.subr.bf16.mxu0 %v5236_v15  ;;  %v5292_v15 = vld [vmem:[%s7146_s4 + $0x50] ss:$8 sps:$4 sm:$0xff]  }
 0x194   :  { %2005 = vmatmul.mubr.bf16.vlgmr.msra.gmra.mxu1 %v5178_v3  ;;  %v5298_v3 = vld [vmem:[%s7146_s4 + $0x40] ss:$8 sps:$4 sm:$0xff]  }
 0x195   :  { %4438 = vmatprep.mubr.msk.bf16.mxu1 %vm1590_vm4, %v4415_v17  ;;  %2386 = vmatpush1.bf16.msra.mxu1 %v5230_v31  ;;  %v5295_v31 = vld [vmem:[%s7146_s4 + $0xe0] ss:$8 sps:$4 sm:$0xff]   ;;  %v5303_v17 = vld [vmem:[%s7146_s4 + $0xd4] ss:$8 sps:$4 sm:$0xff]  }
 0x196   :  { %2599 = vmatpush1.bf16.msra.mxu0 %v5234_v28  ;;  %2387 = vmatprep.subr.bf16.mxu1 %v5239_v42  ;;  %v5300_v28 = vld [vmem:[%s7146_s4 + $0x44] ss:$8 sps:$4 sm:$0xff]   ;;  %v5301_v42 = vld [vmem:[%s7146_s4 + $0xd0] ss:$8 sps:$4 sm:$0xff]  }
 0x197   :  { %2600 = vmatprep.subr.bf16.mxu0 %v5242_v24  ;;  %v5304_v24 = vld [vmem:[%s7146_s4 + $0x30] ss:$8 sps:$4 sm:$0xff]  }
 0x199   :  { %2388 = vmatpush1.bf16.msra.mxu1 %v5237_v45  ;;  %v5307_v45 = vld [vmem:[%s7146_s4 + $0xc0] ss:$8 sps:$4 sm:$0xff]  }
 0x19a   :  { %2601 = vmatpush1.bf16.msra.mxu0 %v5240_v56  ;;  %2389 = vmatprep.subr.bf16.mxu1 %v5246_v46  ;;  %v5312_v56 = vld [vmem:[%s7146_s4 + $0x24] ss:$8 sps:$4 sm:$0xff]   ;;  %v5310_v46 = vld [vmem:[%s7146_s4 + $0x20] ss:$8 sps:$4 sm:$0xff]  }
 0x19b   :  { %2602 = vmatprep.subr.bf16.mxu0 %v5251_v4  ;;  %v5313_v4 = vld [vmem:[%s7146_s4 + $0xb0] ss:$8 sps:$4 sm:$0xff]  }
 0x19c   :  { %2015 = vmatmul.mubr.bf16.gmra.mxu1 %v4414_v5  ;;  %v5321_v5 = vld [vmem:[%s7146_s4 + $0xa4] ss:$8 sps:$4 sm:$0xff]  }
 0x19d   :  { %2390 = vmatpush1.bf16.msra.mxu1 %v5244_v27  ;;  %4529 = vmatprep.mubr.msk.bf16.mxu1 %vm1590_vm4, %v2275_v50  ;;  %v5316_v27 = vld [vmem:[%s7146_s4 + $0x10] ss:$8 sps:$4 sm:$0xff]  }
 0x19e   :  { %2603 = vmatpush1.bf16.msra.mxu0 %v5249_v48  ;;  %2391 = vmatprep.subr.bf16.mxu1 %v5254_v6  ;;  %v5324_v48 = vld [vmem:[%s7146_s4 + $0x4] ss:$8 sps:$4 sm:$0xff]   ;;  %v5322_v6 = vld [vmem:[%s7146_s4] ss:$8 sps:$4 sm:$0xff]   ;;  %v5325_v50 = vld [vmem:[%s7146_s4 + $0x90] ss:$8 sps:$4 sm:$0xff]  }
 0x19f   :  { %2604 = vmatprep.subr.bf16.mxu0 %v5257_v7  ;;  %v5327_v7 = vld [vmem:[%s7146_s4 + $0x94] ss:$8 sps:$4 sm:$0xff]  }
 0x1a1   :  { %2392 = vmatpush1.bf16.msra.mxu1 %v5252_v21  ;;  %v5328_v21 = vld [vmem:[%s7146_s4 + $0x80] ss:$8 sps:$4 sm:$0xff]  }
 0x1a2   :  { %2605 = vmatpush1.bf16.msra.mxu0 %v5255_v30  ;;  %2393 = vmatprep.subr.bf16.mxu1 %v5260_v52  ;;  %v5333_v30 = vld [vmem:[%s7146_s4 + $0x114] ss:$8 sps:$4 sm:$0xff]   ;;  %v5331_v52 = vld [vmem:[%s7146_s4 + $0x110] ss:$8 sps:$4 sm:$0xff]  }
 0x1a3   :  { %4574 = vmatprep.subr.msk.bf16.mxu0 %vm1415_vm1, %v4573_v35  ;;  %v5336_v35 = vld [vmem:[%s7146_s4 + $0x224] ss:$8 sps:$4 sm:$0xff]  }
 0x1a5   :  { %2394 = vmatpush1.bf16.msra.mxu1 %v5258_v54 }
 0x1a6   :  { %2619 = vmatpush2.bf16.msra.mxu0 %v2585_v10  ;;  %2395 = vmatprep.subr.bf16.mxu1 %v5265_v8 }
 0x1a7   :  { %2620 = vmatprep.subr.bf16.mxu0 %v5268_v37 }
 0x1a9   :  { %2396 = vmatpush1.bf16.msra.mxu1 %v5263_v9 }
 0x1aa   :  { %2621 = vmatpush2.bf16.msra.mxu0 %v5266_v13  ;;  %2397 = vmatprep.subr.bf16.mxu1 %v5271_v57 }
 0x1ab   :  { %2945 = vmatprep.subr.bf16.mxu0 %v5282_v41 }
 0x1ad   :  { %2398 = vmatpush1.bf16.msra.mxu1 %v5269_v40  ;;  %2623 = vmatmul.mubr.bf16.vlgmr.msra.gmra.mxu0 %v2477_v16 }
 0x1ae   :  { %4576 = vmatprep.mubr.msk.bf16.mxu0 %vm1590_vm4, %v6453_v29  ;;  %2399 = vmatprep.subr.bf16.mxu1 %v5274_v60  ;;  %v2271_v29 = vrot.slane %v4506_v63, 1 }
 0x1af   :  { %2946 = vmatpush1.bf16.msra.mxu0 %v5280_v59 }
 0x1b0   :  { %v2272_v39 = vsel %vm2269_vm7, %v2270_v38, %v2271_v29  ;;  %2947 = vmatprep.subr.bf16.mxu0 %v5288_v58 }
 0x1b1   :  { %2400 = vmatpush1.bf16.msra.mxu1 %v5272_v44 }
 0x1b2   :  { %4528 = vmatprep.subr.msk.bf16.mxu1 %vm1415_vm1, %v4527_v61 }
 0x1b3   :  { %2948 = vmatpush1.bf16.msra.mxu0 %v5286_v20 }
 0x1b4   :  { %2949 = vmatprep.subr.bf16.mxu0 %v5294_v22 }
 0x1b5   :  { %2414 = vmatpush2.bf16.msra.mxu1 %v2380_v18  ;;  %2633 = vmatmul.mubr.bf16.gmra.mxu0 %v2476_v26 }
 0x1b6   :  { %2415 = vmatprep.subr.bf16.mxu1 %v5279_v62 }
 0x1b7   :  { %2950 = vmatpush1.bf16.msra.mxu0 %v5292_v15 }
 0x1b8   :  { %2951 = vmatprep.subr.bf16.mxu0 %v5300_v28 }
 0x1b9   :  { %2416 = vmatpush2.bf16.msra.mxu1 %v5277_v49 }
 0x1ba   :  { %2811 = vmatprep.subr.bf16.mxu1 %v5285_v14 }
 0x1bb   :  { %2952 = vmatpush1.bf16.msra.mxu0 %v5298_v3 }
 0x1bc   :  { %2418 = vmatmul.mubr.bf16.vlgmr.msra.gmra.mxu1 %v2272_v39  ;;  %2953 = vmatprep.subr.bf16.mxu0 %v5306_v43 }
 0x1bd   :  { %4530 = vmatprep.mubr.msk.bf16.mxu1 %vm1590_vm4, %v6514_v19  ;;  %2812 = vmatpush1.bf16.msra.mxu1 %v5283_v0  ;;  %v5318_v19 = vld [vmem:[%s7146_s4 + $0x14] ss:$8 sps:$4 sm:$0xff]  }
 0x1be   :  { %2813 = vmatprep.subr.bf16.mxu1 %v5291_v23 }
 0x1bf   :  { %2954 = vmatpush1.bf16.msra.mxu0 %v5304_v24 }
 0x1c0   :  { %2955 = vmatprep.subr.bf16.mxu0 %v5312_v56 }
 0x1c1   :  { %2814 = vmatpush1.bf16.msra.mxu1 %v5289_v1 }
 0x1c2   :  { %2815 = vmatprep.subr.bf16.mxu1 %v5297_v2 }
 0x1c3   :  { %2956 = vmatpush1.bf16.msra.mxu0 %v5310_v46 }
 0x1c4   :  { %2428 = vmatmul.mubr.bf16.gmra.mxu1 %v2271_v29  ;;  %2957 = vmatprep.subr.bf16.mxu0 %v5318_v19 }
 0x1c5   :  { %2816 = vmatpush1.bf16.msra.mxu1 %v5295_v31 }
 0x1c6   :  { %2817 = vmatprep.subr.bf16.mxu1 %v5303_v17 }
 0x1c7   :  { %2958 = vmatpush1.bf16.msra.mxu0 %v5316_v27 }
 0x1c8   :  { %2959 = vmatprep.subr.bf16.mxu0 %v5324_v48 }
 0x1c9   :  { %2818 = vmatpush1.bf16.msra.mxu1 %v5301_v42 }
 0x1ca   :  { %2819 = vmatprep.subr.bf16.mxu1 %v5309_v32  ;;  %v2649_v32 = vlaneseq }
 0x1cb   :  { %2960 = vmatpush1.bf16.msra.mxu0 %v5322_v6 }
 0x1cc   :  { %2975 = vmatprep.subr.bf16.mxu0 %v5330_v51 }
 0x1cd   :  { %2820 = vmatpush1.bf16.msra.mxu1 %v5307_v45 }
 0x1ce   :  { %2821 = vmatprep.subr.bf16.mxu1 %v5315_v47  ;;  %v2650_v47 = vshrl.u32 %v2649_v32, 7  ;;  %v5346_v32 = vld [vmem:[%s7146_s4 + $0x200] ss:$8 sps:$4 sm:$0xff]  }
 0x1cf   :  { %2976 = vmatpush2.bf16.msra.mxu0 %v5328_v21 }
 0x1d0   :  { %3259 = vmatprep.subr.bf16.mxu0 %v5336_v35  ;;  %v6716_v21 = vsub.s32 1, %v2650_v47 }
 0x1d1   :  { %2822 = vmatpush1.bf16.msra.mxu1 %v5313_v4 }
 0x1d2   :  { %2823 = vmatprep.subr.bf16.mxu1 %v5321_v5 }
 0x1d5   :  { %2824 = vmatpush1.bf16.msra.mxu1 %v5319_v34  ;;  %v6711_v34 = vsub.s32 0, %v2650_v47  ;;  %v5357_v47 = vld [vmem:[%s7146_s4 + $0x164] ss:$8 sps:$4 sm:$0xff]  }
 0x1d6   :  { %2825 = vmatprep.subr.bf16.mxu1 %v5327_v7 }
 0x1d9   :  { %2826 = vmatpush1.bf16.msra.mxu1 %v5325_v50  ;;  %v2647_v50 = vld [vmem:[%s7147_s3] sm:$0x3] }
 0x1da   :  { %2841 = vmatprep.subr.bf16.mxu1 %v5333_v30 }
 0x1dd   :  { %2842 = vmatpush2.bf16.msra.mxu1 %v5331_v52 }
 0x1de   :  { %3101 = vmatprep.subr.bf16.mxu1 %v5339_v53  ;;  %v2652_v53 = vrot.slane %v2647_v50, %v6711_v34 }
 0x21d   :  { %v1810_v54 = vpop.f32.mrf.mxu0 }
 0x21f   :  { %v1812_v8 = vpop.f32.mrf.mxu0 }
 0x221   :  { %v1814_v10 = vpop.f32.mrf.mxu0 }
 0x223   :  { %v1816_v37 = vpop.f32.mrf.mxu0 }
 0x225   :  { %v1820_v55 = vpop.f32.mrf.mxu0 }
 0x227   :  { %v1822_v9 = vpop.f32.mrf.mxu0 }
 0x229   :  { %v1824_v33 = vpop.f32.mrf.mxu0 }
 0x22b   :  { %v1825_v13 = vpop.f32.mrf.mxu0 }
 0x22c   :  { %v1637_v57 = vpop.f32.mrf.mxu1 }
 0x22d   :  { %v1811_v26 = vadd.f32 %v1810_v54, %v1637_v57 }
 0x22e   :  { %v1639_v40 = vpop.f32.mrf.mxu1 }
 0x22f   :  { %v1813_v36 = vadd.f32 %v1812_v8, %v1639_v40 }
 0x230   :  { %v1641_v60 = vpop.f32.mrf.mxu1 }
 0x231   :  { %v1815_v11 = vadd.f32 %v1814_v10, %v1641_v60 }
 0x232   :  { %v1643_v16 = vpop.f32.mrf.mxu1 }
 0x233   :  { %v1817_v44 = vadd.f32 %v1816_v37, %v1643_v16 }
 0x234   :  { %v1647_v61 = vpop.f32.mrf.mxu1 }
 0x235   :  { %v1821_v12 = vadd.f32 %v1820_v55, %v1647_v61  ;;  %v2656_v55 = vrot.slane %v2647_v50, %v6716_v21  ;;  %v5369_v50 = vld [vmem:[%s7146_s4 + $0x144] ss:$8 sps:$4 sm:$0xff]  }
 0x236   :  { %v1649_v18 = vpop.f32.mrf.mxu1 }
 0x237   :  { %v1823_v62 = vadd.f32 %v1822_v9, %v1649_v18 }
 0x238   :  { %v1651_v63 = vpop.f32.mrf.mxu1 }
 0x23a   :  { %v1652_v25 = vpop.f32.mrf.mxu1 }
 0x245   :  { %v2214_v49 = vpop.f32.mrf.mxu0 }
 0x247   :  { %v2216_v29 = vpop.f32.mrf.mxu0 }
 0x249   :  { %v2218_v38 = vpop.f32.mrf.mxu0 }
 0x24b   :  { %v2220_v39 = vpop.f32.mrf.mxu0 }
 0x24d   :  { %v2224_v59 = vpop.f32.mrf.mxu0 }
 0x24f   :  { %v2226_v41 = vpop.f32.mrf.mxu0 }
 0x251   :  { %v2228_v0 = vpop.f32.mrf.mxu0 }
 0x253   :  { %v2229_v14 = vpop.f32.mrf.mxu0 }
 0x254   :  { %v2006_v20 = vpop.f32.mrf.mxu1 }
 0x255   :  { %v2023_v4 = vadd.f32 %v2006_v20, %v1811_v26 }
 0x256   :  { %v2008_v58 = vpop.f32.mrf.mxu1 }
 0x257   :  { %v2024_v27 = vadd.f32 %v2008_v58, %v1813_v36  ;;  %v2231_v7 = vadd.f32 %v2214_v49, %v2023_v4  ;;  %v5352_v4 = vld [vmem:[%s7146_s4 + $0x1f0] ss:$8 sps:$4 sm:$0xff]  }
 0x258   :  { %v2010_v1 = vpop.f32.mrf.mxu1 }
 0x259   :  { %v2025_v48 = vadd.f32 %v2010_v1, %v1815_v11  ;;  %v2232_v35 = vadd.f32 %v2216_v29, %v2024_v27  ;;  %v5355_v27 = vld [vmem:[%s7146_s4 + $0x160] ss:$8 sps:$4 sm:$0xff]  }
 0x25a   :  { %v2012_v23 = vpop.f32.mrf.mxu1 }
 0x25b   :  { %v2026_v30 = vadd.f32 %v2012_v23, %v1817_v44  ;;  %v2233_v37 = vadd.f32 %v2218_v38, %v2025_v48  ;;  %v5334_v23 = vld [vmem:[%s7146_s4 + $0x220] ss:$8 sps:$4 sm:$0xff]  }
 0x25c   :  { %v2016_v15 = vpop.f32.mrf.mxu1  ;;  %v5358_v48 = vld [vmem:[%s7146_s4 + $0x1e0] ss:$8 sps:$4 sm:$0xff]  }
 0x25d   :  { %v2027_v22 = vadd.f32 %v2016_v15, %v1821_v12  ;;  %v2234_v57 = vadd.f32 %v2220_v39, %v2026_v30  ;;  %v5372_v30 = vld [vmem:[%s7146_s4 + $0x1c4] ss:$8 sps:$4 sm:$0xff]  }
 0x25e   :  { %v2018_v31 = vpop.f32.mrf.mxu1 }
 0x25f   :  { %v2028_v2 = vadd.f32 %v2018_v31, %v1823_v62  ;;  %v2235_v3 = vadd.f32 %v2224_v59, %v2027_v22  ;;  %v5337_v22 = vld [vmem:[%s7146_s4 + $0x190] ss:$8 sps:$4 sm:$0xff]  }
 0x260   :  { %v2020_v28 = vpop.f32.mrf.mxu1 }
 0x261   :  { %v2236_v42 = vadd.f32 %v2226_v41, %v2028_v2  ;;  %v5345_v28 = vld [vmem:[%s7146_s4 + $0x184] ss:$8 sps:$4 sm:$0xff]  }
 0x262   :  { %v2021_v17 = vpop.f32.mrf.mxu1 }
 0x263   :  { %v5340_v17 = vld [vmem:[%s7146_s4 + $0x210] ss:$8 sps:$4 sm:$0xff]  }
 0x26d   :  { %v2624_v24 = vpop.f32.mrf.mxu0 }
 0x26f   :  { %v2626_v43 = vpop.f32.mrf.mxu0 }
 0x271   :  { %v2628_v45 = vpop.f32.mrf.mxu0 }
 0x273   :  { %v2630_v56 = vpop.f32.mrf.mxu0 }
 0x275   :  { %v2634_v46 = vpop.f32.mrf.mxu0 }
 0x277   :  { %v2636_v19 = vpop.f32.mrf.mxu0 }
 0x279   :  { %v2638_v5 = vpop.f32.mrf.mxu0 }
 0x27a   :  { %v5363_v5 = vld [vmem:[%s7146_s4 + $0x154] ss:$8 sps:$4 sm:$0xff]  }
 0x27b   :  { %v2639_v6 = vpop.f32.mrf.mxu0 }
 0x27c   :  { %v2419_v51 = vpop.f32.mrf.mxu1  ;;  %v5366_v6 = vld [vmem:[%s7146_s4 + $0x1d4] ss:$8 sps:$4 sm:$0xff]  }
 0x27d   :  { %v2436_v52 = vadd.f32 %v2419_v51, %v2231_v7  ;;  %v5361_v7 = vld [vmem:[%s7146_s4 + $0x150] ss:$8 sps:$4 sm:$0xff]  }
 0x27e   :  { %v2421_v54 = vpop.f32.mrf.mxu1  ;;  %v5364_v51 = vld [vmem:[%s7146_s4 + $0x1d0] ss:$8 sps:$4 sm:$0xff]  }
 0x27f   :  { %v2641_v8 = vadd.f32 %v2624_v24, %v2436_v52  ;;  %v2437_v10 = vadd.f32 %v2421_v54, %v2232_v35  ;;  %v5348_v24 = vld [vmem:[%s7146_s4 + $0x204] ss:$8 sps:$4 sm:$0xff]   ;;  %v5367_v52 = vld [vmem:[%s7146_s4 + $0x140] ss:$8 sps:$4 sm:$0xff]   ;;  %v5375_v35 = vld [vmem:[%s7146_s4 + $0x134] ss:$8 sps:$4 sm:$0xff]  }
 0x280   :  { %v2423_v9 = vpop.f32.mrf.mxu1  ;;  %v5378_v54 = vld [vmem:[%s7146_s4 + $0x1b4] ss:$8 sps:$4 sm:$0xff]  }
 0x281   :  { %v2642_v33 = vadd.f32 %v2626_v43, %v2437_v10  ;;  %v2438_v13 = vadd.f32 %v2423_v9, %v2233_v37  ;;  %v2659_v26 = vadd.f32 %v2652_v53, %v2641_v8  ;;  %v5343_v43 = vld [vmem:[%s7146_s4 + $0x180] ss:$8 sps:$4 sm:$0xff]   ;;  %v5373_v8 = vld [vmem:[%s7146_s4 + $0x130] ss:$8 sps:$4 sm:$0xff]   ;;  %v5381_v10 = vld [vmem:[%s7146_s4 + $0x124] ss:$8 sps:$4 sm:$0xff]  }
 0x282   :  { %v2425_v40 = vpop.f32.mrf.mxu1  ;;  %v5376_v37 = vld [vmem:[%s7146_s4 + $0x1b0] ss:$8 sps:$4 sm:$0xff]   ;;  %v5379_v9 = vld [vmem:[%s7146_s4 + $0x120] ss:$8 sps:$4 sm:$0xff]  }
 0x283   :  { %v2643_v36 = vadd.f32 %v2628_v45, %v2438_v13  ;;  %v2439_v60 = vadd.f32 %v2425_v40, %v2234_v57  ;;  %v2660_v11 = vadd.f32 %v2656_v55, %v2642_v33  ;;  %v2665_v18 = vmax.f32 %v2659_v26, 0.0  ;;  %v5351_v45 = vld [vmem:[%s7146_s4 + $0x174] ss:$8 sps:$4 sm:$0xff]   ;;  %v5387_v33 = vld [vmem:[%s7146_s4 + $0x1a4] ss:$8 sps:$4 sm:$0xff]  }
 0x284   :  { %v2429_v16 = vpop.f32.mrf.mxu1  ;;  %v5382_v13 = vld [vmem:[%s7146_s4 + $0x230] ss:$8 sps:$4 sm:$0xff]   ;;  %v5390_v57 = vld [vmem:[%s7146_s4 + $0x344] ss:$8 sps:$4 sm:$0xff]   ;;  %v5385_v26 = vld [vmem:[%s7146_s4 + $0x1a0] ss:$8 sps:$4 sm:$0xff]  }
 0x285   :  { %v2661_v44 = vadd.f32 %v2652_v53, %v2643_v36  ;;  %v2644_v61 = vadd.f32 %v2630_v56, %v2439_v60  ;;  %v2440_v12 = vadd.f32 %v2429_v16, %v2235_v3  ;;  %v2666_v38 = vmax.f32 %v2660_v11, 0.0  ;;  %v5342_v3 = vld [vmem:[%s7146_s4 + $0x214] ss:$8 sps:$4 sm:$0xff]   ;;  %v5388_v36 = vld [vmem:[%s7146_s4 + $0x340] ss:$8 sps:$4 sm:$0xff]  }
 0x286   :  { %v2431_v62 = vpop.f32.mrf.mxu1  ;;  %v5354_v56 = vld [vmem:[%s7146_s4 + $0x1f4] ss:$8 sps:$4 sm:$0xff]  }
 0x287   :  { %v2667_v63 = vmax.f32 %v2661_v44, 0.0  ;;  %v2662_v25 = vadd.f32 %v2656_v55, %v2644_v61  ;;  %v2645_v49 = vadd.f32 %v2634_v46, %v2440_v12  ;;  %v2441_v29 = vadd.f32 %v2431_v62, %v2236_v42  ;;  %v5349_v46 = vld [vmem:[%s7146_s4 + $0x170] ss:$8 sps:$4 sm:$0xff]   ;;  %v5393_v40 = vld [vmem:[%s7146_s4 + $0x2b4] ss:$8 sps:$4 sm:$0xff]  }
 0x288   :  { %v2433_v59 = vpop.f32.mrf.mxu1  ;;  %v5396_v11 = vld [vmem:[%s7146_s4 + $0x334] ss:$8 sps:$4 sm:$0xff]   ;;  %v5391_v44 = vld [vmem:[%s7146_s4 + $0x2b0] ss:$8 sps:$4 sm:$0xff]   ;;  %v5399_v12 = vld [vmem:[%s7146_s4 + $0x2a4] ss:$8 sps:$4 sm:$0xff]  }
 0x289   :  { %v6720_v41 = vpack.c.bf16 %v2667_v63, %v2665_v18  ;;  %v2668_v39 = vmax.f32 %v2662_v25, 0.0  ;;  %v6722_v0 = vadd.f32 %v2652_v53, %v2645_v49  ;;  %v2646_v14 = vadd.f32 %v2636_v19, %v2441_v29  ;;  %v5360_v19 = vld [vmem:[%s7146_s4 + $0x1e4] ss:$8 sps:$4 sm:$0xff]   ;;  %v5370_v53 = vld [vmem:[%s7146_s4 + $0x1c0] ss:$8 sps:$4 sm:$0xff]  }
 0x28a   :  { %v2434_v20 = vpop.f32.mrf.mxu1  ;;  %v5394_v62 = vld [vmem:[%s7146_s4 + $0x330] ss:$8 sps:$4 sm:$0xff]   ;;  %v5402_v63 = vld [vmem:[%s7146_s4 + $0x324] ss:$8 sps:$4 sm:$0xff]   ;;  %v5397_v25 = vld [vmem:[%s7146_s4 + $0x2a0] ss:$8 sps:$4 sm:$0xff]  }
 0x28b   :  { %v6724_v58 = vpack.c.bf16 %v2668_v39, %v2666_v38  ;;  %v6726_v1 = vadd.f32 %v2656_v55, %v2646_v14  ;;  %v2714_v2 = vrot.slane %v6720_v41, 1  ;;  %v5384_v55 = vld [vmem:[%s7146_s4 + $0x234] ss:$8 sps:$4 sm:$0xff]   ;;  %v3163_v60 = vrot.slane %v6720_v41, 3  ;;  %v5400_v29 = vld [vmem:[%s7146_s4 + $0x320] ss:$8 sps:$4 sm:$0xff]  }
 0x28c   :  { %v3005_v61 = vrot.slane %v6720_v41, 2  ;;  %v5405_v49 = vld [vmem:[%s7146_s4 + $0x294] ss:$8 sps:$4 sm:$0xff]   ;;  %v5403_v59 = vld [vmem:[%s7146_s4 + $0x290] ss:$8 sps:$4 sm:$0xff]  }
 0x28d   :  { %4632 = vmatprep.mubr.msk.bf16.mxu0 %vm2807_vm8, %v6724_v58  ;;  %v2715_v15 = vrot.slane %v6724_v58, 1  ;;  %v3164_v31 = vrot.slane %v6724_v58, 3  ;;  %v3006_v42 = vrot.slane %v6724_v58, 2  ;;  %v3480_v16 = vrot.slane %v6724_v58, 5  ;;  %v5408_v38 = vld [vmem:[%s7146_s4 + $0x314] ss:$8 sps:$4 sm:$0xff]  }
 0x28e   :  { %2978 = vmatmul.mubr.bf16.vlgmr.msra.gmra.mxu0 %v6720_v41  ;;  %v3322_v18 = vrot.slane %v6724_v58, 4  ;;  %v5411_v39 = vld [vmem:[%s7146_s4 + $0x284] ss:$8 sps:$4 sm:$0xff]   ;;  %v5406_v14 = vld [vmem:[%s7146_s4 + $0x310] ss:$8 sps:$4 sm:$0xff]  }
 0x28f   :  { %3260 = vmatpush1.bf16.msra.mxu0 %v5334_v23  ;;  %4613 = vmatprep.mubr.msk.bf16.mxu1 %vm2807_vm8, %v2715_v15  ;;  %v5414_v20 = vld [vmem:[%s7146_s4 + $0x304] ss:$8 sps:$4 sm:$0xff]   ;;  %v5409_v23 = vld [vmem:[%s7146_s4 + $0x280] ss:$8 sps:$4 sm:$0xff]   ;;  %v5417_v15 = vld [vmem:[%s7146_s4 + $0x274] ss:$8 sps:$4 sm:$0xff]  }
 0x290   :  { %4706 = vmatprep.mubr.msk.bf16.mxu0 %vm2807_vm8, %v3164_v31  ;;  %2844 = vmatmul.mubr.bf16.vlgmr.msra.gmra.mxu1 %v2714_v2  ;;  %v5420_v31 = vld [vmem:[%s7146_s4 + $0x2f4] ss:$8 sps:$4 sm:$0xff]   ;;  %v5415_v2 = vld [vmem:[%s7146_s4 + $0x270] ss:$8 sps:$4 sm:$0xff]  }
 0x291   :  { %3102 = vmatpush1.bf16.msra.mxu1 %v5337_v22  ;;  %4669 = vmatprep.mubr.msk.bf16.mxu1 %vm2807_vm8, %v3006_v42  ;;  %v5412_v22 = vld [vmem:[%s7146_s4 + $0x300] ss:$8 sps:$4 sm:$0xff]   ;;  %v5426_v42 = vld [vmem:[%s7146_s4 + $0x2e4] ss:$8 sps:$4 sm:$0xff]  }
 0x292   :  { %3261 = vmatprep.subr.bf16.mxu0 %v5342_v3  ;;  %3103 = vmatprep.subr.bf16.mxu1 %v5345_v28  ;;  %v5423_v3 = vld [vmem:[%s7146_s4 + $0x264] ss:$8 sps:$4 sm:$0xff]   ;;  %v5418_v28 = vld [vmem:[%s7146_s4 + $0x2f0] ss:$8 sps:$4 sm:$0xff]  }
 0x293   :  { %3262 = vmatpush1.bf16.msra.mxu0 %v5340_v17  ;;  %v5421_v17 = vld [vmem:[%s7146_s4 + $0x260] ss:$8 sps:$4 sm:$0xff]  }
 0x294   :  { %3263 = vmatprep.subr.bf16.mxu0 %v5348_v24  ;;  %v5429_v24 = vld [vmem:[%s7146_s4 + $0x254] ss:$8 sps:$4 sm:$0xff]  }
 0x295   :  { %3104 = vmatpush1.bf16.msra.mxu1 %v5343_v43  ;;  %v5424_v43 = vld [vmem:[%s7146_s4 + $0x2e0] ss:$8 sps:$4 sm:$0xff]  }
 0x296   :  { %3105 = vmatprep.subr.bf16.mxu1 %v5351_v45  ;;  %v5432_v45 = vld [vmem:[%s7146_s4 + $0x2d4] ss:$8 sps:$4 sm:$0xff]  }
 0x297   :  { %3264 = vmatpush1.bf16.msra.mxu0 %v5346_v32  ;;  %v5427_v32 = vld [vmem:[%s7146_s4 + $0x250] ss:$8 sps:$4 sm:$0xff]  }
 0x298   :  { %3265 = vmatprep.subr.bf16.mxu0 %v5354_v56  ;;  %v5435_v56 = vld [vmem:[%s7146_s4 + $0x244] ss:$8 sps:$4 sm:$0xff]  }
 0x299   :  { %3106 = vmatpush1.bf16.msra.mxu1 %v5349_v46  ;;  %v5430_v46 = vld [vmem:[%s7146_s4 + $0x2d0] ss:$8 sps:$4 sm:$0xff]  }
 0x29a   :  { %3107 = vmatprep.subr.bf16.mxu1 %v5357_v47  ;;  %v5438_v47 = vld [vmem:[%s7146_s4 + $0x354] ss:$8 sps:$4 sm:$0xff]  }
 0x29b   :  { %3266 = vmatpush1.bf16.msra.mxu0 %v5352_v4  ;;  %v5433_v4 = vld [vmem:[%s7146_s4 + $0x240] ss:$8 sps:$4 sm:$0xff]  }
 0x29c   :  { %3267 = vmatprep.subr.bf16.mxu0 %v5360_v19  ;;  %v5441_v19 = vld [vmem:[%s7146_s4 + $0x2c4] ss:$8 sps:$4 sm:$0xff]  }
 0x29d   :  { %3108 = vmatpush1.bf16.msra.mxu1 %v5355_v27  ;;  %v5436_v27 = vld [vmem:[%s7146_s4 + $0x350] ss:$8 sps:$4 sm:$0xff]  }
 0x29e   :  { %3109 = vmatprep.subr.bf16.mxu1 %v5363_v5  ;;  %v5444_v5 = vld [vmem:[%s7146_s4 + $0x464] ss:$8 sps:$4 sm:$0xff]  }
 0x29f   :  { %3268 = vmatpush1.bf16.msra.mxu0 %v5358_v48  ;;  %v5439_v48 = vld [vmem:[%s7146_s4 + $0x2c0] ss:$8 sps:$4 sm:$0xff]  }
 0x2a0   :  { %3269 = vmatprep.subr.bf16.mxu0 %v5366_v6  ;;  %v5447_v6 = vld [vmem:[%s7146_s4 + $0x3d4] ss:$8 sps:$4 sm:$0xff]  }
 0x2a1   :  { %3110 = vmatpush1.bf16.msra.mxu1 %v5361_v7  ;;  %v5442_v7 = vld [vmem:[%s7146_s4 + $0x460] ss:$8 sps:$4 sm:$0xff]  }
 0x2a2   :  { %3111 = vmatprep.subr.bf16.mxu1 %v5369_v50  ;;  %v3479_v50 = vrot.slane %v6720_v41, 5 }
 0x2a3   :  { %3270 = vmatpush1.bf16.msra.mxu0 %v5364_v51  ;;  %v5450_v51 = vld [vmem:[%s7146_s4 + $0x454] ss:$8 sps:$4 sm:$0xff]  }
 0x2a4   :  { %3271 = vmatprep.subr.bf16.mxu0 %v5372_v30  ;;  %v3796_v30 = vrot.slane %v6724_v58, 7 }
 0x2a5   :  { %3112 = vmatpush1.bf16.msra.mxu1 %v5367_v52  ;;  %v5445_v52 = vld [vmem:[%s7146_s4 + $0x3d0] ss:$8 sps:$4 sm:$0xff]  }
 0x2a6   :  { %3113 = vmatprep.subr.bf16.mxu1 %v5375_v35  ;;  %v3321_v35 = vrot.slane %v6720_v41, 4 }
 0x2a7   :  { %3272 = vmatpush1.bf16.msra.mxu0 %v5370_v53  ;;  %v5453_v53 = vld [vmem:[%s7146_s4 + $0x3c4] ss:$8 sps:$4 sm:$0xff]  }
 0x2a8   :  { %3273 = vmatprep.subr.bf16.mxu0 %v5378_v54  ;;  %v3638_v54 = vrot.slane %v6724_v58, 6  ;;  %v5459_v58 = vld [vmem:[%s7146_s4 + $0x3b4] ss:$8 sps:$4 sm:$0xff]  }
 0x2a9   :  { %3114 = vmatpush1.bf16.msra.mxu1 %v5373_v8  ;;  %v5448_v8 = vld [vmem:[%s7146_s4 + $0x450] ss:$8 sps:$4 sm:$0xff]  }
 0x2aa   :  { %3115 = vmatprep.subr.bf16.mxu1 %v5381_v10  ;;  %v5456_v10 = vld [vmem:[%s7146_s4 + $0x444] ss:$8 sps:$4 sm:$0xff]  }
 0x2ab   :  { %3274 = vmatpush1.bf16.msra.mxu0 %v5376_v37  ;;  %v5451_v37 = vld [vmem:[%s7146_s4 + $0x3c0] ss:$8 sps:$4 sm:$0xff]  }
 0x2ac   :  { %3289 = vmatprep.subr.bf16.mxu0 %v5384_v55  ;;  %v5454_v55 = vld [vmem:[%s7146_s4 + $0x440] ss:$8 sps:$4 sm:$0xff]  }
 0x2ad   :  { %3116 = vmatpush1.bf16.msra.mxu1 %v5379_v9  ;;  %v5462_v9 = vld [vmem:[%s7146_s4 + $0x434] ss:$8 sps:$4 sm:$0xff]  }
 0x2ae   :  { %3131 = vmatprep.subr.bf16.mxu1 %v5387_v33  ;;  %v5457_v33 = vld [vmem:[%s7146_s4 + $0x3b0] ss:$8 sps:$4 sm:$0xff]  }
 0x2af   :  { %3290 = vmatpush2.bf16.msra.mxu0 %v5382_v13  ;;  %v5465_v13 = vld [vmem:[%s7146_s4 + $0x3a4] ss:$8 sps:$4 sm:$0xff]  }
 0x2b0   :  { %3575 = vmatprep.subr.bf16.mxu0 %v5390_v57  ;;  %v5460_v57 = vld [vmem:[%s7146_s4 + $0x430] ss:$8 sps:$4 sm:$0xff]  }
 0x2b1   :  { %3132 = vmatpush2.bf16.msra.mxu1 %v5385_v26  ;;  %v5468_v26 = vld [vmem:[%s7146_s4 + $0x424] ss:$8 sps:$4 sm:$0xff]  }
 0x2b2   :  { %3292 = vmatmul.mubr.bf16.vlgmr.msra.gmra.mxu0 %v3163_v60  ;;  %3417 = vmatprep.subr.bf16.mxu1 %v5393_v40  ;;  %v5463_v40 = vld [vmem:[%s7146_s4 + $0x3a0] ss:$8 sps:$4 sm:$0xff]  }
 0x2b3   :  { %3576 = vmatpush1.bf16.msra.mxu0 %v5388_v36  ;;  %4780 = vmatprep.mubr.msk.bf16.mxu0 %vm2807_vm8, %v3480_v16  ;;  %v5471_v36 = vld [vmem:[%s7146_s4 + $0x394] ss:$8 sps:$4 sm:$0xff]   ;;  %v5466_v60 = vld [vmem:[%s7146_s4 + $0x420] ss:$8 sps:$4 sm:$0xff]   ;;  %v5469_v16 = vld [vmem:[%s7146_s4 + $0x390] ss:$8 sps:$4 sm:$0xff]  }
 0x2b4   :  { %3134 = vmatmul.mubr.bf16.vlgmr.msra.gmra.mxu1 %v3005_v61  ;;  %3577 = vmatprep.subr.bf16.mxu0 %v5396_v11  ;;  %v5474_v11 = vld [vmem:[%s7146_s4 + $0x414] ss:$8 sps:$4 sm:$0xff]   ;;  %v5472_v61 = vld [vmem:[%s7146_s4 + $0x410] ss:$8 sps:$4 sm:$0xff]  }
 0x2b5   :  { %3418 = vmatpush1.bf16.msra.mxu1 %v5391_v44  ;;  %4743 = vmatprep.mubr.msk.bf16.mxu1 %vm2807_vm8, %v3322_v18  ;;  %v5477_v44 = vld [vmem:[%s7146_s4 + $0x384] ss:$8 sps:$4 sm:$0xff]   ;;  %v5475_v18 = vld [vmem:[%s7146_s4 + $0x380] ss:$8 sps:$4 sm:$0xff]  }
 0x2b6   :  { %3419 = vmatprep.subr.bf16.mxu1 %v5399_v12  ;;  %v5480_v12 = vld [vmem:[%s7146_s4 + $0x404] ss:$8 sps:$4 sm:$0xff]  }
 0x2b7   :  { %3578 = vmatpush1.bf16.msra.mxu0 %v5394_v62  ;;  %v5483_v62 = vld [vmem:[%s7146_s4 + $0x374] ss:$8 sps:$4 sm:$0xff]  }
 0x2b8   :  { %3579 = vmatprep.subr.bf16.mxu0 %v5402_v63  ;;  %v5478_v63 = vld [vmem:[%s7146_s4 + $0x400] ss:$8 sps:$4 sm:$0xff]  }
 0x2b9   :  { %3420 = vmatpush1.bf16.msra.mxu1 %v5397_v25  ;;  %v5486_v25 = vld [vmem:[%s7146_s4 + $0x3f4] ss:$8 sps:$4 sm:$0xff]  }
 0x2ba   :  { %3421 = vmatprep.subr.bf16.mxu1 %v5405_v49  ;;  %v5481_v49 = vld [vmem:[%s7146_s4 + $0x370] ss:$8 sps:$4 sm:$0xff]  }
 0x2bb   :  { %3580 = vmatpush1.bf16.msra.mxu0 %v5400_v29  ;;  %v5489_v29 = vld [vmem:[%s7146_s4 + $0x364] ss:$8 sps:$4 sm:$0xff]  }
 0x2bc   :  { %3581 = vmatprep.subr.bf16.mxu0 %v5408_v38  ;;  %v5484_v38 = vld [vmem:[%s7146_s4 + $0x3f0] ss:$8 sps:$4 sm:$0xff]  }
 0x2bd   :  { %3422 = vmatpush1.bf16.msra.mxu1 %v5403_v59  ;;  %v5492_v59 = vld [vmem:[%s7146_s4 + $0x474] ss:$8 sps:$4 sm:$0xff]  }
 0x2be   :  { %3423 = vmatprep.subr.bf16.mxu1 %v5411_v39  ;;  %v5487_v39 = vld [vmem:[%s7146_s4 + $0x360] ss:$8 sps:$4 sm:$0xff]  }
 0x2bf   :  { %3582 = vmatpush1.bf16.msra.mxu0 %v5406_v14  ;;  %v5495_v14 = vld [vmem:[%s7146_s4 + $0x3e4] ss:$8 sps:$4 sm:$0xff]  }
 0x2c0   :  { %3583 = vmatprep.subr.bf16.mxu0 %v5414_v20  ;;  %v5490_v20 = vld [vmem:[%s7146_s4 + $0x470] ss:$8 sps:$4 sm:$0xff]  }
 0x2c1   :  { %3424 = vmatpush1.bf16.msra.mxu1 %v5409_v23  ;;  %v5493_v23 = vld [vmem:[%s7146_s4 + $0x3e0] ss:$8 sps:$4 sm:$0xff]  }
 0x2c2   :  { %3425 = vmatprep.subr.bf16.mxu1 %v5417_v15  ;;  %v5498_v15 = vld [vmem:[%s7146_s4 + $0x4f4] ss:$8 sps:$4 sm:$0xff]  }
 0x2c3   :  { %3584 = vmatpush1.bf16.msra.mxu0 %v5412_v22  ;;  %v2670_v22 = vmax.f32 %v6726_v1, 0.0  ;;  %v5499_v1 = vld [vmem:[%s7146_s4 + $0x4e0] ss:$8 sps:$4 sm:$0xff]  }
 0x2c4   :  { %3585 = vmatprep.subr.bf16.mxu0 %v5420_v31  ;;  %v3795_v31 = vrot.slane %v6720_v41, 7 }
 0x2c5   :  { %3426 = vmatpush1.bf16.msra.mxu1 %v5415_v2  ;;  %v5496_v2 = vld [vmem:[%s7146_s4 + $0x4f0] ss:$8 sps:$4 sm:$0xff]  }
 0x2c6   :  { %3427 = vmatprep.subr.bf16.mxu1 %v5423_v3  ;;  %v3637_v3 = vrot.slane %v6720_v41, 6  ;;  %v5502_v41 = vld [vmem:[%s7146_s4 + $0x4d0] ss:$8 sps:$4 sm:$0xff]  }
 0x2c7   :  { %3586 = vmatpush1.bf16.msra.mxu0 %v5418_v28  ;;  %v5501_v28 = vld [vmem:[%s7146_s4 + $0x4e4] ss:$8 sps:$4 sm:$0xff]  }
 0x2c8   :  { %3587 = vmatprep.subr.bf16.mxu0 %v5426_v42  ;;  %v2674_v42 = vpack.c.bf16 %v2670_v22, %v2670_v22 }
 0x2c9   :  { %3428 = vmatpush1.bf16.msra.mxu1 %v5421_v17  ;;  %v5504_v17 = vld [vmem:[%s7146_s4 + $0x4d4] ss:$8 sps:$4 sm:$0xff]  }
 0x2ca   :  { %3429 = vmatprep.subr.bf16.mxu1 %v5429_v24  ;;  %v5507_v24 = vld [vmem:[%s7146_s4 + $0x4c4] ss:$8 sps:$4 sm:$0xff]  }
 0x2cb   :  { %3588 = vmatpush1.bf16.msra.mxu0 %v5424_v43  ;;  %v5505_v43 = vld [vmem:[%s7146_s4 + $0x4c0] ss:$8 sps:$4 sm:$0xff]  }
 0x2cc   :  { %3589 = vmatprep.subr.bf16.mxu0 %v5432_v45  ;;  %v5510_v45 = vld [vmem:[%s7146_s4 + $0x4b4] ss:$8 sps:$4 sm:$0xff]  }
 0x2cd   :  { %3430 = vmatpush1.bf16.msra.mxu1 %v5427_v32  ;;  %v5508_v32 = vld [vmem:[%s7146_s4 + $0x4b0] ss:$8 sps:$4 sm:$0xff]  }
 0x2ce   :  { %3431 = vmatprep.subr.bf16.mxu1 %v5435_v56  ;;  %v5513_v56 = vld [vmem:[%s7146_s4 + $0x4a4] ss:$8 sps:$4 sm:$0xff]  }
 0x2cf   :  { %3590 = vmatpush1.bf16.msra.mxu0 %v5430_v46  ;;  %v5511_v46 = vld [vmem:[%s7146_s4 + $0x4a0] ss:$8 sps:$4 sm:$0xff]  }
 0x2d0   :  { %3605 = vmatprep.subr.bf16.mxu0 %v5438_v47  ;;  %v5516_v47 = vld [vmem:[%s7146_s4 + $0x494] ss:$8 sps:$4 sm:$0xff]  }
 0x2d1   :  { %3432 = vmatpush1.bf16.msra.mxu1 %v5433_v4  ;;  %v5514_v4 = vld [vmem:[%s7146_s4 + $0x490] ss:$8 sps:$4 sm:$0xff]  }
 0x2d2   :  { %3447 = vmatprep.subr.bf16.mxu1 %v5441_v19  ;;  %v5519_v19 = vld [vmem:[%s7146_s4 + $0x484] ss:$8 sps:$4 sm:$0xff]  }
 0x2d3   :  { %3606 = vmatpush2.bf16.msra.mxu0 %v5436_v27  ;;  %v5517_v27 = vld [vmem:[%s7146_s4 + $0x480] ss:$8 sps:$4 sm:$0xff]  }
 0x2d4   :  { %3891 = vmatprep.subr.bf16.mxu0 %v5444_v5  ;;  %v5522_v5 = vld [vmem:[%s7146_s4 + $0x504] ss:$8 sps:$4 sm:$0xff]  }
 0x2d5   :  { %3448 = vmatpush2.bf16.msra.mxu1 %v5439_v48  ;;  %v5520_v48 = vld [vmem:[%s7146_s4 + $0x500] ss:$8 sps:$4 sm:$0xff]  }
 0x2d6   :  { %3608 = vmatmul.mubr.bf16.vlgmr.msra.gmra.mxu0 %v3479_v50  ;;  %3733 = vmatprep.subr.bf16.mxu1 %v5447_v6  ;;  %v2669_v6 = vmax.f32 %v6722_v0, 0.0 }
 0x2d7   :  { %3892 = vmatpush1.bf16.msra.mxu0 %v5442_v7  ;;  %4854 = vmatprep.mubr.msk.bf16.mxu0 %vm2807_vm8, %v3796_v30 }
 0x2d8   :  { %3450 = vmatmul.mubr.bf16.vlgmr.msra.gmra.mxu1 %v3321_v35  ;;  %3893 = vmatprep.subr.bf16.mxu0 %v5450_v51  ;;  %v2673_v7 = vpack.c.bf16 %v2669_v6, %v2669_v6 }
 0x2d9   :  { %3734 = vmatpush1.bf16.msra.mxu1 %v5445_v52  ;;  %4817 = vmatprep.mubr.msk.bf16.mxu1 %vm2807_vm8, %v3638_v54 }
 0x2da   :  { %3735 = vmatprep.subr.bf16.mxu1 %v5453_v53 }
 0x2db   :  { %3894 = vmatpush1.bf16.msra.mxu0 %v5448_v8 }
 0x2dc   :  { %3895 = vmatprep.subr.bf16.mxu0 %v5456_v10 }
 0x2dd   :  { %3736 = vmatpush1.bf16.msra.mxu1 %v5451_v37 }
 0x2de   :  { %3737 = vmatprep.subr.bf16.mxu1 %v5459_v58  ;;  %v13_v58 = vstv %s7148_s7 }
 0x2df   :  { %3896 = vmatpush1.bf16.msra.mxu0 %v5454_v55  ;;  %14 = vst [vmem:[#allocation3] sm:$0x1] %v13_v58 }
 0x2e0   :  { %3897 = vmatprep.subr.bf16.mxu0 %v5462_v9 }
 0x2e1   :  { %3738 = vmatpush1.bf16.msra.mxu1 %v5457_v33 }
 0x2e2   :  { %3739 = vmatprep.subr.bf16.mxu1 %v5465_v13 }
 0x2e3   :  { %3898 = vmatpush1.bf16.msra.mxu0 %v5460_v57 }
 0x2e4   :  { %3899 = vmatprep.subr.bf16.mxu0 %v5468_v26 }
 0x2e5   :  { %3740 = vmatpush1.bf16.msra.mxu1 %v5463_v40 }
 0x2e6   :  { %3741 = vmatprep.subr.bf16.mxu1 %v5471_v36 }
 0x2e7   :  { %3900 = vmatpush1.bf16.msra.mxu0 %v5466_v60 }
 0x2e8   :  { %3901 = vmatprep.subr.bf16.mxu0 %v5474_v11 }
 0x2e9   :  { %3742 = vmatpush1.bf16.msra.mxu1 %v5469_v16 }
 0x2ea   :  { %3743 = vmatprep.subr.bf16.mxu1 %v5477_v44 }
 0x2eb   :  { %3902 = vmatpush1.bf16.msra.mxu0 %v5472_v61 }
 0x2ec   :  { %3903 = vmatprep.subr.bf16.mxu0 %v5480_v12 }
 0x2ed   :  { %3744 = vmatpush1.bf16.msra.mxu1 %v5475_v18 }
 0x2ee   :  { %3745 = vmatprep.subr.bf16.mxu1 %v5483_v62 }
 0x2ef   :  { %3904 = vmatpush1.bf16.msra.mxu0 %v5478_v63 }
 0x2f0   :  { %3905 = vmatprep.subr.bf16.mxu0 %v5486_v25 }
 0x2f1   :  { %3746 = vmatpush1.bf16.msra.mxu1 %v5481_v49 }
 0x2f2   :  { %3747 = vmatprep.subr.bf16.mxu1 %v5489_v29 }
 0x2f3   :  { %3906 = vmatpush1.bf16.msra.mxu0 %v5484_v38 }
 0x2f4   :  { %3921 = vmatprep.subr.bf16.mxu0 %v5492_v59 }
 0x2f5   :  { %3748 = vmatpush1.bf16.msra.mxu1 %v5487_v39 }
 0x2f6   :  { %3763 = vmatprep.subr.bf16.mxu1 %v5495_v14 }
 0x2f7   :  { %3922 = vmatpush2.bf16.msra.mxu0 %v5490_v20 }
 0x2f9   :  { %3764 = vmatpush2.bf16.msra.mxu1 %v5493_v23 }
 0x2fa   :  { %3924 = vmatmul.mubr.bf16.vlgmr.msra.gmra.mxu0 %v3795_v31  ;;  %4046 = vmatprep.subr.bf16.mxu1 %v5498_v15 }
 0x2fc   :  { %3766 = vmatmul.mubr.bf16.vlgmr.msra.gmra.mxu1 %v3637_v3 }
 0x2fd   :  { %4047 = vmatpush1.bf16.msra.mxu1 %v5496_v2  ;;  %4891 = vmatprep.mubr.msk.bf16.mxu1 %vm2807_vm8, %v2674_v42  ;;  %v4089_v42 = vld [vmem:[%s7149_s5] sm:$0x3] }
 0x2fe   :  { %4048 = vmatprep.subr.bf16.mxu1 %v5501_v28 }
 0x301   :  { %4049 = vmatpush1.bf16.msra.mxu1 %v5499_v1 }
 0x302   :  { %4050 = vmatprep.subr.bf16.mxu1 %v5504_v17 }
 0x305   :  { %4051 = vmatpush1.bf16.msra.mxu1 %v5502_v41  ;;  %v4094_v41 = vrot.slane %v4089_v42, %v6711_v34 }
 0x306   :  { %4052 = vmatprep.subr.bf16.mxu1 %v5507_v24 }
 0x309   :  { %4053 = vmatpush1.bf16.msra.mxu1 %v5505_v43  ;;  %v4105_v43 = vld [vmem:[%s7150_s6] sm:$0x3] }
 0x30a   :  { %4054 = vmatprep.subr.bf16.mxu1 %v5510_v45  ;;  %v4114_v6 = vrot.slane %v4105_v43, %v6716_v21 }
 0x30d   :  { %4055 = vmatpush1.bf16.msra.mxu1 %v5508_v32 }
 0x30e   :  { %4056 = vmatprep.subr.bf16.mxu1 %v5513_v56  ;;  %v4098_v56 = vrot.slane %v4089_v42, %v6716_v21 }
 0x311   :  { %4057 = vmatpush1.bf16.msra.mxu1 %v5511_v46 }
 0x312   :  { %4058 = vmatprep.subr.bf16.mxu1 %v5516_v47 }
 0x315   :  { %4059 = vmatpush1.bf16.msra.mxu1 %v5514_v4 }
 0x316   :  { %4060 = vmatprep.subr.bf16.mxu1 %v5519_v19  ;;  %v4110_v19 = vrot.slane %v4105_v43, %v6711_v34 }
 0x319   :  { %4061 = vmatpush1.bf16.msra.mxu1 %v5517_v27 }
 0x31a   :  { %4076 = vmatprep.subr.bf16.mxu1 %v5522_v5 }
 0x31d   :  { %4077 = vmatpush2.bf16.msra.mxu1 %v5520_v48 }
 0x320   :  { %4079 = vmatmul.mubr.bf16.vlgmr.msra.gmra.mxu1 %v2673_v7 }
 0x34e   :  { %v2979_v50 = vpop.f32.mrf.mxu0 }
 0x350   :  { %v2845_v51 = vpop.f32.mrf.mxu1  ;;  %v2981_v30 = vpop.f32.mrf.mxu0 }
 0x351   :  { %v2980_v52 = vadd.f32 %v2979_v50, %v2845_v51 }
 0x352   :  { %v2847_v35 = vpop.f32.mrf.mxu1  ;;  %v2983_v53 = vpop.f32.mrf.mxu0 }
 0x353   :  { %v2982_v54 = vadd.f32 %v2981_v30, %v2847_v35 }
 0x354   :  { %v2849_v8 = vpop.f32.mrf.mxu1  ;;  %v2984_v10 = vpop.f32.mrf.mxu0 }
 0x356   :  { %v2850_v37 = vpop.f32.mrf.mxu1 }
 0x372   :  { %v3293_v0 = vpop.f32.mrf.mxu0 }
 0x374   :  { %v3135_v55 = vpop.f32.mrf.mxu1  ;;  %v3295_v9 = vpop.f32.mrf.mxu0 }
 0x375   :  { %v3142_v33 = vadd.f32 %v3135_v55, %v2980_v52 }
 0x376   :  { %v3137_v13 = vpop.f32.mrf.mxu1  ;;  %v3297_v57 = vpop.f32.mrf.mxu0 }
 0x377   :  { %v3143_v26 = vadd.f32 %v3137_v13, %v2982_v54  ;;  %v3300_v40 = vadd.f32 %v3293_v0, %v3142_v33  ;;  %v4892_v54 = vld [vmem:[#allocation3] ss:$0 sm:$0xff] }
 0x378   :  { %v3139_v36 = vpop.f32.mrf.mxu1  ;;  %v3298_v60 = vpop.f32.mrf.mxu0 }
 0x379   :  { %v3301_v11 = vadd.f32 %v3295_v9, %v3143_v26 }
 0x37a   :  { %v3140_v16 = vpop.f32.mrf.mxu1 }
 0x396   :  { %v3609_v44 = vpop.f32.mrf.mxu0 }
 0x398   :  { %v3451_v61 = vpop.f32.mrf.mxu1  ;;  %v3611_v12 = vpop.f32.mrf.mxu0 }
 0x399   :  { %v3458_v18 = vadd.f32 %v3451_v61, %v3300_v40 }
 0x39a   :  { %v3453_v62 = vpop.f32.mrf.mxu1  ;;  %v3613_v63 = vpop.f32.mrf.mxu0 }
 0x39b   :  { %v3459_v25 = vadd.f32 %v3453_v62, %v3301_v11  ;;  %v3616_v49 = vadd.f32 %v3609_v44, %v3458_v18 }
 0x39c   :  { %v3455_v29 = vpop.f32.mrf.mxu1  ;;  %v3614_v38 = vpop.f32.mrf.mxu0 }
 0x39d   :  { %v3617_v59 = vadd.f32 %v3611_v12, %v3459_v25 }
 0x39e   :  { %v3456_v39 = vpop.f32.mrf.mxu1 }
 0x3ba   :  { %v3925_v14 = vpop.f32.mrf.mxu0 }
 0x3bc   :  { %v3767_v20 = vpop.f32.mrf.mxu1  ;;  %v3927_v23 = vpop.f32.mrf.mxu0 }
 0x3bd   :  { %v3774_v28 = vadd.f32 %v3767_v20, %v3616_v49 }
 0x3be   :  { %v3769_v15 = vpop.f32.mrf.mxu1  ;;  %v3929_v22 = vpop.f32.mrf.mxu0 }
 0x3bf   :  { %v3775_v1 = vadd.f32 %v3769_v15, %v3617_v59  ;;  %v3932_v17 = vadd.f32 %v3925_v14, %v3774_v28 }
 0x3c0   :  { %v3771_v31 = vpop.f32.mrf.mxu1  ;;  %v3930_v2 = vpop.f32.mrf.mxu0 }
 0x3c1   :  { %v3933_v32 = vadd.f32 %v3927_v23, %v3775_v1 }
 0x3c2   :  { %v3772_v3 = vpop.f32.mrf.mxu1 }
 0x3e0   :  { %v4080_v24 = vpop.f32.mrf.mxu1 }
 0x3e1   :  { %v4087_v45 = vadd.f32 %v4080_v24, %v3932_v17 }
 0x3e2   :  { %v4082_v46 = vpop.f32.mrf.mxu1 }
 0x3e3   :  { %v4101_v47 = vadd.f32 %v4094_v41, %v4087_v45  ;;  %v4088_v4 = vadd.f32 %v4082_v46, %v3933_v32 }
 0x3e4   :  { %v4084_v27 = vpop.f32.mrf.mxu1 }
 0x3e5   :  { %v4103_v5 = vmax.f32 %v4101_v47, 0.0  ;;  %v4102_v48 = vadd.f32 %v4098_v56, %v4088_v4 }
 0x3e6   :  { %v4085_v7 = vpop.f32.mrf.mxu1 }
 0x3e7   :  { %v4104_v50 = vmax.f32 %v4102_v48, 0.0  ;;  %v4117_v51 = vmul.f32 %v4110_v19, %v4103_v5 }
 0x3e9   :  { %v4118_v30 = vmul.f32 %v4114_v6, %v4104_v50  ;;  %v4120_v52 = vsel %vm4119_vm9, %v4117_v51, 0.0 }
 0x3eb   :  { %v4121_v35 = vsel %vm4119_vm9, %v4118_v30, 0.0 }
 0x3ec   :  { %v4122_v53 = vadd.f32 %v4121_v35, %v4120_v52 }
 0x3ee   :  { %4123 = vadd.xlane.f32.xlu0 %v4122_v53 }
 0x477   :  { %v4124_v8 = vpop.xlane.xlu0 %4123 }
 0x478   :  { %v4132_v10 = vadd.f32 %v4892_v54, %v4124_v8 }
 0x47a   :  { %v4893_v37 = vmul.f32 -1.442695, %v4132_v10 }
 0x47c   :  { %5523 = vpow2.f32 %v4893_v37 }
 0x489   :  { %v5524_v34 = vpop.eup %5523 }
 0x48a   :  { %v4136_v58 = vadd.f32 1.0, %v5524_v34 }
 0x48c   :  { %5525 = vrcp.f32 %v4136_v58 }
 0x499   :  { %v5526_v0 = vpop.eup %5525 }
 0x49a   :  { %4140 = vst.msk [vmem:[%s7151_s8] sm:$0x3] %vm4139_vm10, %v5526_v0 }

</bundles_post_ra>
